<compile_context>
chip_gen: v5e
topology: v5e:2x2
jax: 0.10.0
libtpu: 0.0.40
codegen_flags: <defaults>
</compile_context>

<pallas_src>
import jax
import jax.numpy as jnp
from jax.experimental import pallas as pl
from jax.experimental.pallas import tpu as pltpu


# ------------------------------- Pallas kernel -------------------------------

def _self_attention_kernel(gamma_ref, x_ref, wq_ref, bq_ref, wk_ref, bk_ref,
                           wv_ref, bv_ref, o_ref, k_scr, v_scr):
    # gamma_ref: (1,)      SMEM scalar
    # x_ref    : (C, HW)   one image, channels-first, HW on the lane axis (f32)
    # wq/wk    : (Cq, C)   wv: (C, C)        -- compute dtype (bf16)
    # bq/bk    : (Cq, 1)   bv: (C, 1)        -- f32 columns
    # o_ref    : (C, TQ)   output tile for TQ query positions
    # k_scr    : (Cq, HW)  v_scr: (C, HW)    -- VMEM scratch, compute dtype
    cdt = wq_ref.dtype
    tq = o_ref.shape[-1]
    qi = pl.program_id(1)

    # --- K / V projections: once per image, reused by every query tile. -----
    @pl.when(qi == 0)
    def _():
        x_c = x_ref[...].astype(cdt)                                  # (C, HW)
        k = jnp.dot(wk_ref[...], x_c,
                    preferred_element_type=jnp.float32) + bk_ref[...]  # (Cq, HW)
        v = jnp.dot(wv_ref[...], x_c,
                    preferred_element_type=jnp.float32) + bv_ref[...]  # (C,  HW)
        k_scr[...] = k.astype(cdt)
        v_scr[...] = v.astype(cdt)

    # --- Q projection for this query tile (same orientation as K). ----------
    start = pl.multiple_of(qi * tq, tq)
    x_blk = x_ref[:, pl.ds(start, tq)]                                 # (C, TQ) f32
    q = jnp.dot(wq_ref[...], x_blk.astype(cdt),
                preferred_element_type=jnp.float32) + bq_ref[...]      # (Cq, TQ) f32

    # logits[i, j] = q[:, i] . k[:, j]   (contract the Cq axis of both)
    logits = jax.lax.dot_general(q.astype(cdt), k_scr[...],
                                 (((0,), (0,)), ((), ())),
                                 preferred_element_type=jnp.float32)   # (TQ, HW)

    # Row softmax over keys (lane axis), f32 math (v5e-safe), EUP reciprocal.
    m = jnp.max(logits, axis=-1, keepdims=True)
    e = jnp.exp(logits - m)
    attn = e * pl.reciprocal(jnp.sum(e, axis=-1, keepdims=True), approx=True)

    # out[c, i] = sum_j v[c, j] * attn[i, j]   (contraction over keys)
    out_blk = jax.lax.dot_general(v_scr[...], attn.astype(cdt),
                                  (((1,), (1,)), ((), ())),
                                  preferred_element_type=jnp.float32)  # (C, TQ)

    o_ref[...] = gamma_ref[0] * out_blk + x_blk


# ------------------------------ kernel wrapper -------------------------------

def self_attention_forward(x_nchw, p, *, tq=None, compute_dtype=jnp.bfloat16):
    """x_nchw: (B, C, H, W) like PyTorch.  p holds PyTorch-shaped 1x1-conv
    weights (Cout, Cin), biases (Cout,), and gamma (1,)."""
    B, C, H, W = x_nchw.shape
    HW = H * W
    Cq = p["wq"].shape[0]

    # Query-tile size: whole image when small (one lane-dense store / image);
    # otherwise a 128-multiple divisor of HW to bound the (TQ, HW) logits tile.
    if tq is None:
        tq = HW if HW <= 512 else 512
    if HW % tq != 0:
        tq = HW
    n_q = HW // tq

    x = x_nchw.reshape(B, C, HW)              # NCHW -> (B, C, HW): no transpose

    out = pl.pallas_call(
        _self_attention_kernel,
        out_shape=jax.ShapeDtypeStruct((B, C, HW), jnp.float32),
        grid=(B, n_q),
        in_specs=[
            pl.BlockSpec(memory_space=pltpu.MemorySpace.SMEM),       # gamma (1,)
            pl.BlockSpec((None, C, HW), lambda b, i: (b, 0, 0)),     # x image
            pl.BlockSpec((Cq, C), lambda b, i: (0, 0)),              # wq
            pl.BlockSpec((Cq, 1), lambda b, i: (0, 0)),              # bq col
            pl.BlockSpec((Cq, C), lambda b, i: (0, 0)),              # wk
            pl.BlockSpec((Cq, 1), lambda b, i: (0, 0)),              # bk col
            pl.BlockSpec((C, C), lambda b, i: (0, 0)),               # wv
            pl.BlockSpec((C, 1), lambda b, i: (0, 0)),               # bv col
        ],
        out_specs=pl.BlockSpec((None, C, tq), lambda b, i: (b, 0, i)),
        scratch_shapes=[
            pltpu.VMEM((Cq, HW), compute_dtype),     # K, computed once / image
            pltpu.VMEM((C, HW), compute_dtype),      # V, computed once / image
        ],
        compiler_params=pltpu.CompilerParams(
            dimension_semantics=("parallel", "arbitrary")),
    )(p["gamma"].astype(jnp.float32), x.astype(jnp.float32),
      p["wq"].astype(compute_dtype), p["bq"].reshape(Cq, 1).astype(jnp.float32),
      p["wk"].astype(compute_dtype), p["bk"].reshape(Cq, 1).astype(jnp.float32),
      p["wv"].astype(compute_dtype), p["bv"].reshape(C, 1).astype(jnp.float32))

    return out.reshape(B, C, H, W)


# ------------------------ pure-JAX reference (NCHW) ---------------------------

def _ref_forward(x, p, compute_dtype=jnp.bfloat16):
    """Reference mirroring the kernel's precision policy (matmul operands in
    `compute_dtype`, f32 accumulation / softmax / biases / residual), so the
    comparison isolates structural bugs rather than bf16 rounding."""
    f32 = jnp.float32
    c = lambda a: a.astype(compute_dtype)
    B, C, H, W = x.shape
    HW = H * W
    xm = x.reshape(B, C, HW)

    q = jnp.einsum('oc,bcn->bon', c(p["wq"]), c(xm),
                   preferred_element_type=f32) + p["bq"][None, :, None]
    k = jnp.einsum('oc,bcn->bon', c(p["wk"]), c(xm),
                   preferred_element_type=f32) + p["bk"][None, :, None]
    v = jnp.einsum('oc,bcn->bon', c(p["wv"]), c(xm),
                   preferred_element_type=f32) + p["bv"][None, :, None]

    logits = jnp.einsum('bci,bcj->bij', c(q), c(k), preferred_element_type=f32)
    attn = jax.nn.softmax(logits, axis=-1)
    out = jnp.einsum('bcj,bij->bci', c(v), c(attn), preferred_element_type=f32)
    return (p["gamma"][0] * out + xm).reshape(B, C, H, W)


# ----------------------------------- main -------------------------------------

if __name__ == "__main__":
    B, C, H, W = 2, 32, 16, 16        # in_dim must satisfy in_dim // 8 >= 1
    Cq = C // 8

    key = jax.random.PRNGKey(0)
    ks = jax.random.split(key, 7)
    p = {
        "wq": 0.2 * jax.random.normal(ks[0], (Cq, C), jnp.float32),
        "bq": 0.1 * jax.random.normal(ks[1], (Cq,), jnp.float32),
        "wk": 0.2 * jax.random.normal(ks[2], (Cq, C), jnp.float32),
        "bk": 0.1 * jax.random.normal(ks[3], (Cq,), jnp.float32),
        "wv": 0.2 * jax.random.normal(ks[4], (C, C), jnp.float32),
        "bv": 0.1 * jax.random.normal(ks[5], (C,), jnp.float32),
        # Freshly-constructed module has gamma = 0 (output == x); use a nonzero
        # gamma here so the attention path is actually exercised by the check.
        "gamma": jnp.full((1,), 0.5, jnp.float32),
    }
    x = jax.random.normal(ks[6], (B, C, H, W), jnp.float32)   # NCHW like PyTorch

    out = self_attention_forward(x, p)
    out = jax.block_until_ready(out)
    assert out.shape == (B, C, H, W)

    ref = _ref_forward(x, p)
    # Tolerance covers the EUP approximate reciprocal and accumulation-order
    # differences; bf16 operand rounding is mirrored by the reference.
    assert jnp.allclose(out, ref, rtol=1e-2, atol=1e-2), "mismatch vs JAX reference"

    print("KERNEL_OK")
</pallas_src>

<mosaic_0001>
module attributes {stable_mosaic.version = 11 : i64} {
  func.func @_self_attention_kernel(%arg0: i32, %arg1: i32, %arg2: memref<1xf32, #tpu.memory_space<smem>>, %arg3: memref<1x32x256xf32, #tpu.memory_space<vmem>>, %arg4: memref<4x32xbf16, #tpu.memory_space<vmem>>, %arg5: memref<4x1xf32, #tpu.memory_space<vmem>>, %arg6: memref<4x32xbf16, #tpu.memory_space<vmem>>, %arg7: memref<4x1xf32, #tpu.memory_space<vmem>>, %arg8: memref<32x32xbf16, #tpu.memory_space<vmem>>, %arg9: memref<32x1xf32, #tpu.memory_space<vmem>>, %arg10: memref<1x32x256xf32, #tpu.memory_space<vmem>>, %arg11: memref<4x256xbf16, #tpu.memory_space<vmem>>, %arg12: memref<32x256xbf16, #tpu.memory_space<vmem>>) attributes {dimension_semantics = [#tpu.dimension_semantics<parallel>, #tpu.dimension_semantics<arbitrary>], iteration_bounds = array<i64: 2, 1>, scalar_prefetch = 0 : i64, scratch_operands = 2 : i64, tpu.core_type = #tpu.core_type<tc>, window_params = [{transform_indices = @transform_0, window_bounds = array<i64: 1>}, {transform_indices = @transform_1, window_bounds = array<i64: 1, 32, 256>}, {pipeline_mode = #tpu.pipeline_mode<synchronous>, transform_indices = @transform_2, window_bounds = array<i64: 4, 32>}, {pipeline_mode = #tpu.pipeline_mode<synchronous>, transform_indices = @transform_3, window_bounds = array<i64: 4, 1>}, {pipeline_mode = #tpu.pipeline_mode<synchronous>, transform_indices = @transform_4, window_bounds = array<i64: 4, 32>}, {pipeline_mode = #tpu.pipeline_mode<synchronous>, transform_indices = @transform_5, window_bounds = array<i64: 4, 1>}, {pipeline_mode = #tpu.pipeline_mode<synchronous>, transform_indices = @transform_6, window_bounds = array<i64: 32, 32>}, {pipeline_mode = #tpu.pipeline_mode<synchronous>, transform_indices = @transform_7, window_bounds = array<i64: 32, 1>}, {transform_indices = @transform_8, window_bounds = array<i64: 1, 32, 256>}]} {
    %c0_i32 = arith.constant 0 : i32
    %0 = arith.cmpi eq, %arg1, %c0_i32 : i32
    %1 = arith.extui %0 : i1 to i32
    %c0_i32_0 = arith.constant 0 : i32
    %2 = arith.cmpi ne, %1, %c0_i32_0 : i32
    scf.if %2 {
      %c0_18 = arith.constant 0 : index
      %c0_19 = arith.constant 0 : index
      %c0_20 = arith.constant 0 : index
      %37 = vector.load %arg3[%c0_18, %c0_19, %c0_20] : memref<1x32x256xf32, #tpu.memory_space<vmem>>, vector<1x32x256xf32>
      %38 = vector.shape_cast %37 : vector<1x32x256xf32> to vector<32x256xf32>
      %39 = arith.truncf %38 : vector<32x256xf32> to vector<32x256xbf16>
      %c0_21 = arith.constant 0 : index
      %c0_22 = arith.constant 0 : index
      %40 = vector.load %arg6[%c0_21, %c0_22] : memref<4x32xbf16, #tpu.memory_space<vmem>>, vector<4x32xbf16>
      %cst_23 = arith.constant dense<0.000000e+00> : vector<4x256xf32>
      %41 = tpu.matmul %40, %39, %cst_23 {dimension_numbers = #tpu.dot_dimension_numbers<[1], [0], [0], [1], [0, 0, 1, 1], [], []>} : vector<4x32xbf16>, vector<32x256xbf16>, vector<4x256xf32> -> vector<4x256xf32>
      %c0_24 = arith.constant 0 : index
      %c0_25 = arith.constant 0 : index
      %42 = vector.load %arg7[%c0_24, %c0_25] : memref<4x1xf32, #tpu.memory_space<vmem>>, vector<4x1xf32>
      %43 = vector.broadcast %42 : vector<4x1xf32> to vector<4x256xf32>
      %44 = arith.addf %41, %43 : vector<4x256xf32>
      %c0_26 = arith.constant 0 : index
      %c0_27 = arith.constant 0 : index
      %45 = vector.load %arg8[%c0_26, %c0_27] : memref<32x32xbf16, #tpu.memory_space<vmem>>, vector<32x32xbf16>
      %cst_28 = arith.constant dense<0.000000e+00> : vector<32x256xf32>
      %46 = tpu.matmul %45, %39, %cst_28 {dimension_numbers = #tpu.dot_dimension_numbers<[1], [0], [0], [1], [0, 0, 1, 1], [], []>} : vector<32x32xbf16>, vector<32x256xbf16>, vector<32x256xf32> -> vector<32x256xf32>
      %c0_29 = arith.constant 0 : index
      %c0_30 = arith.constant 0 : index
      %47 = vector.load %arg9[%c0_29, %c0_30] : memref<32x1xf32, #tpu.memory_space<vmem>>, vector<32x1xf32>
      %48 = vector.broadcast %47 : vector<32x1xf32> to vector<32x256xf32>
      %49 = arith.addf %46, %48 : vector<32x256xf32>
      %50 = arith.truncf %44 : vector<4x256xf32> to vector<4x256xbf16>
      %c0_31 = arith.constant 0 : index
      %c0_32 = arith.constant 0 : index
      %51 = vector.load %arg11[%c0_31, %c0_32] : memref<4x256xbf16, #tpu.memory_space<vmem>>, vector<4x256xbf16>
      tpu.vector_store %arg11[%c0_31, %c0_32], %50 {strides = array<i32>} : memref<4x256xbf16, #tpu.memory_space<vmem>>, vector<4x256xbf16>,
      %52 = arith.truncf %49 : vector<32x256xf32> to vector<32x256xbf16>
      %c0_33 = arith.constant 0 : index
      %c0_34 = arith.constant 0 : index
      %53 = vector.load %arg12[%c0_33, %c0_34] : memref<32x256xbf16, #tpu.memory_space<vmem>>, vector<32x256xbf16>
      tpu.vector_store %arg12[%c0_33, %c0_34], %52 {strides = array<i32>} : memref<32x256xbf16, #tpu.memory_space<vmem>>, vector<32x256xbf16>,
    } else {
    }
    %c256_i32 = arith.constant 256 : i32
    %3 = arith.muli %arg1, %c256_i32 : i32
    %4 = tpu.assume_multiple %3, 256 : i32
    %c0 = arith.constant 0 : index
    %c0_1 = arith.constant 0 : index
    %5 = arith.index_cast %4 : i32 to index
    %6 = vector.load %arg3[%c0, %c0_1, %5] : memref<1x32x256xf32, #tpu.memory_space<vmem>>, vector<1x32x256xf32>
    %7 = vector.shape_cast %6 : vector<1x32x256xf32> to vector<32x256xf32>
    %c0_2 = arith.constant 0 : index
    %c0_3 = arith.constant 0 : index
    %8 = vector.load %arg4[%c0_2, %c0_3] : memref<4x32xbf16, #tpu.memory_space<vmem>>, vector<4x32xbf16>
    %9 = arith.truncf %7 : vector<32x256xf32> to vector<32x256xbf16>
    %cst = arith.constant dense<0.000000e+00> : vector<4x256xf32>
    %10 = tpu.matmul %8, %9, %cst {dimension_numbers = #tpu.dot_dimension_numbers<[1], [0], [0], [1], [0, 0, 1, 1], [], []>} : vector<4x32xbf16>, vector<32x256xbf16>, vector<4x256xf32> -> vector<4x256xf32>
    %c0_4 = arith.constant 0 : index
    %c0_5 = arith.constant 0 : index
    %11 = vector.load %arg5[%c0_4, %c0_5] : memref<4x1xf32, #tpu.memory_space<vmem>>, vector<4x1xf32>
    %12 = vector.broadcast %11 : vector<4x1xf32> to vector<4x256xf32>
    %13 = arith.addf %10, %12 : vector<4x256xf32>
    %14 = arith.truncf %13 : vector<4x256xf32> to vector<4x256xbf16>
    %c0_6 = arith.constant 0 : index
    %c0_7 = arith.constant 0 : index
    %15 = vector.load %arg11[%c0_6, %c0_7] : memref<4x256xbf16, #tpu.memory_space<vmem>>, vector<4x256xbf16>
    %cst_8 = arith.constant dense<0.000000e+00> : vector<256x256xf32>
    %16 = tpu.matmul %14, %15, %cst_8 {dimension_numbers = #tpu.dot_dimension_numbers<[0], [0], [1], [1], [0, 1, 1, 1], [], []>} : vector<4x256xbf16>, vector<4x256xbf16>, vector<256x256xf32> -> vector<256x256xf32>
    %cst_9 = arith.constant dense<0xFF800000> : vector<256xf32>
    %17 = vector.multi_reduction <maximumf>, %16, %cst_9 [1] : vector<256x256xf32> to vector<256xf32>
    %18 = vector.shape_cast %17 : vector<256xf32> to vector<256x1xf32>
    %19 = vector.broadcast %18 : vector<256x1xf32> to vector<256x256xf32>
    %20 = arith.subf %16, %19 : vector<256x256xf32>
    %21 = math.exp %20 : vector<256x256xf32>
    %cst_10 = arith.constant dense<0.000000e+00> : vector<256xf32>
    %22 = vector.multi_reduction <add>, %21, %cst_10 [1] : vector<256x256xf32> to vector<256xf32>
    %23 = vector.shape_cast %22 : vector<256xf32> to vector<256x1xf32>
    %24 = tpu.reciprocal %23 {approx = true} : vector<256x1xf32> -> vector<256x1xf32>
    %25 = vector.broadcast %24 : vector<256x1xf32> to vector<256x256xf32>
    %26 = arith.mulf %21, %25 : vector<256x256xf32>
    %c0_11 = arith.constant 0 : index
    %c0_12 = arith.constant 0 : index
    %27 = vector.load %arg12[%c0_11, %c0_12] : memref<32x256xbf16, #tpu.memory_space<vmem>>, vector<32x256xbf16>
    %28 = arith.truncf %26 : vector<256x256xf32> to vector<256x256xbf16>
    %cst_13 = arith.constant dense<0.000000e+00> : vector<32x256xf32>
    %29 = tpu.matmul %27, %28, %cst_13 {dimension_numbers = #tpu.dot_dimension_numbers<[1], [1], [0], [0], [0, 0, 1, 0], [], []>} : vector<32x256xbf16>, vector<256x256xbf16>, vector<32x256xf32> -> vector<32x256xf32>
    %c0_14 = arith.constant 0 : index
    %30 = memref.load %arg2[%c0_14] : memref<1xf32, #tpu.memory_space<smem>>
    %31 = vector.broadcast %30 : f32 to vector<32x256xf32>
    %32 = arith.mulf %31, %29 : vector<32x256xf32>
    %33 = arith.addf %32, %7 : vector<32x256xf32>
    %c0_15 = arith.constant 0 : index
    %c0_16 = arith.constant 0 : index
    %c0_17 = arith.constant 0 : index
    %34 = vector.load %arg10[%c0_15, %c0_16, %c0_17] : memref<1x32x256xf32, #tpu.memory_space<vmem>>, vector<1x32x256xf32>
    %35 = vector.shape_cast %34 : vector<1x32x256xf32> to vector<32x256xf32>
    %36 = vector.shape_cast %33 : vector<32x256xf32> to vector<1x32x256xf32>
    tpu.vector_store %arg10[%c0_15, %c0_16, %c0_17], %36 {strides = array<i32>} : memref<1x32x256xf32, #tpu.memory_space<vmem>>, vector<1x32x256xf32>,
    return
  }
  func.func @transform_0(%arg0: i32, %arg1: i32) -> i32 {
    %c0_i32 = arith.constant 0 : i32
    %c0_i32_0 = arith.constant 0 : i32
    return %c0_i32 : i32
  }
  func.func @transform_1(%arg0: i32, %arg1: i32) -> (i32, i32, i32) {
    %c0_i32 = arith.constant 0 : i32
    %c0_i32_0 = arith.constant 0 : i32
    %c0_i32_1 = arith.constant 0 : i32
    return %arg0, %c0_i32, %c0_i32_0 : i32, i32, i32
  }
  func.func @transform_2(%arg0: i32, %arg1: i32) -> (i32, i32) {
    %c0_i32 = arith.constant 0 : i32
    %c0_i32_0 = arith.constant 0 : i32
    %c0_i32_1 = arith.constant 0 : i32
    return %c0_i32, %c0_i32_0 : i32, i32
  }
  func.func @transform_3(%arg0: i32, %arg1: i32) -> (i32, i32) {
    %c0_i32 = arith.constant 0 : i32
    %c0_i32_0 = arith.constant 0 : i32
    %c0_i32_1 = arith.constant 0 : i32
    return %c0_i32, %c0_i32_0 : i32, i32
  }
  func.func @transform_4(%arg0: i32, %arg1: i32) -> (i32, i32) {
    %c0_i32 = arith.constant 0 : i32
    %c0_i32_0 = arith.constant 0 : i32
    %c0_i32_1 = arith.constant 0 : i32
    return %c0_i32, %c0_i32_0 : i32, i32
  }
  func.func @transform_5(%arg0: i32, %arg1: i32) -> (i32, i32) {
    %c0_i32 = arith.constant 0 : i32
    %c0_i32_0 = arith.constant 0 : i32
    %c0_i32_1 = arith.constant 0 : i32
    return %c0_i32, %c0_i32_0 : i32, i32
  }
  func.func @transform_6(%arg0: i32, %arg1: i32) -> (i32, i32) {
    %c0_i32 = arith.constant 0 : i32
    %c0_i32_0 = arith.constant 0 : i32
    %c0_i32_1 = arith.constant 0 : i32
    return %c0_i32, %c0_i32_0 : i32, i32
  }
  func.func @transform_7(%arg0: i32, %arg1: i32) -> (i32, i32) {
    %c0_i32 = arith.constant 0 : i32
    %c0_i32_0 = arith.constant 0 : i32
    %c0_i32_1 = arith.constant 0 : i32
    return %c0_i32, %c0_i32_0 : i32, i32
  }
  func.func @transform_8(%arg0: i32, %arg1: i32) -> (i32, i32, i32) {
    %c0_i32 = arith.constant 0 : i32
    %c0_i32_0 = arith.constant 0 : i32
    return %arg0, %c0_i32, %arg1 : i32, i32, i32
  }
}

</mosaic_0001>

<bundles_post_ra>
// kernel: tpu_custom_call.1
= control target key start
LH: loop header
LB: loop body
LE: loop exit
PB: predicated region body
PF: predicated region fallthrough
CT: control target
= control target key end

     0   :  { %s3022_s0 = inlined_call_operand.<no memory space> [shape: f32[1], index: 0, kind: input, shape index: {}]   ;;  %s3023_s1 = inlined_call_operand.hbm [shape: f32[2,32,256], index: 1, kind: input, shape index: {}]   ;;  %s3024_s2 = inlined_call_operand.vmem [shape: bf16[4,32], index: 2, kind: input, shape index: {}]   ;;  %s3025_s3 = inlined_call_operand.vmem [shape: f32[4,1], index: 3, kind: input, shape index: {}]   ;;  %s3026_s4 = inlined_call_operand.vmem [shape: bf16[4,32], index: 4, kind: input, shape index: {}]   ;;  %s3027_s5 = inlined_call_operand.vmem [shape: f32[4,1], index: 5, kind: input, shape index: {}]   ;;  %s3028_s6 = inlined_call_operand.vmem [shape: bf16[32,32], index: 6, kind: input, shape index: {}]   ;;  %s3029_s7 = inlined_call_operand.vmem [shape: f32[32,1], index: 7, kind: input, shape index: {}]   ;;  %s3030_s8 = inlined_call_operand.hbm [shape: f32[2,32,256], index: 8, kind: output, shape index: {}]  }
   0x1   :  { %13 = sst [smem:[#allocation4]] %s3022_s0 }
   0x2   :  { %14 = vsyncpa [#allocation6], 0 }
   0x3   :  { %16 = vsyncpa [#allocation6 + $0x1], 0 }
   0x4   :  { %17 = vsyncpa [#allocation7], 0 }
   0x5   :  { %19 = vsyncpa [#allocation7 + $0x1], 0  ;;  %s2080_s29 = smov 0   ;;  %s2082_s30 = smov 0  }
   0x6   :  { %s2084_s9 = smov 0   ;;  %s2086_s10 = smov 0  }
   0x7   :  { %s2088_s11 = smov 0   ;;  %s2090_s12 = smov 0  }
   0x8 LB: > { %3069 = sst [smem:[#allocation11_spill]] %s2021_s11  ;;  %s1554_s0 = sadd.s32 4294967295, %s2025_s12   ;;  %s2025_s12 = sphi %s2090_s12, %s25_s12   ;;  %s2021_s11 = sphi %s2088_s11, %s3179_s11   ;;  %s2017_s10 = sphi %s2086_s10, %s3178_s10   ;;  %s2013_s9 = sphi %s2084_s9, %s3182_s9   ;;  %s2009_s30 = sphi %s2082_s30, %s3181_s30   ;;  %s2005_s29 = sphi %s2080_s29, %s3180_s29  }
   0x9   : > { %s1555_s13 = sadd.s32 4294967294, %s2025_s12   ;;  %s37_s14 = sadd.s32 1, %s2021_s11 }
   0xa   : > { %s65_s15 = sadd.s32 1, %s2013_s9  ;;  %p39_p0 = scmp.ge.s32.totalorder %s37_s14, 2 }
   0xb   : > { %p72_p1 = scmp.ne.s32.totalorder %s2013_s9, %s2009_s30  ;;  %p73_p2 = scmp.eq.s32.totalorder %s2025_s12, 0 }
   0xc   : > { %p78_p3 = scmp.ne.s32.totalorder %s2009_s30, %s2005_s29  ;;  %s3184_s14 = smov (%p39_p0, %s37_s14), 0 }
   0xd   : > { %3070 = sst [smem:[#allocation12_spill]] %s3184_s14  ;;  %p2121_p4 = por %p73_p2, %p72_p1 }
   0xe   : > { %p79_p5 = scmp.eq.s32.totalorder %s1554_s0, 0  ;;  %s62_s17 = ssub.s32 %s2021_s11, %s3184_s14 }
   0xf   : > { %p230_p6 = scmp.eq.s32.totalorder %s1554_s0, 1  ;;  %p63_p7 = scmp.eq.s32.totalorder %s62_s17, 0 }
  0x10   : > { %p2127_p8 = por %p79_p5, %p78_p3  ;;  %p236_p10 = scmp.eq.s32.totalorder %s1555_s13, 1 }
  0x11   : > { %p2131_p9 = por %p230_p6, %p72_p1  ;;  %p1557_p12 = scmp.ge.s32.totalorder %s2025_s12, 2 }
  0x12   : > { %s2136_s20 = scalar_select %p63_p7, %s2013_s9, %s65_s15  }
  0x13   : > { %p2138_p11 = por %p236_p10, %p78_p3  ;;  %p1655_p13 = scmp.lt.s32.totalorder %s2025_s12, 2 }
  0x14   : > { %s277_s22 = sand.u32 1, %s2013_s9   ;;  %s1633_s24 = sshll.u32 %s2021_s11, 6 }
  0x15   : > { %s1558_s23 = sshll.u32 %s277_s22, 6  ;;  %s286_s27 = scalar_lea.hbm %s3023_s1, %s1633_s24 }
  0x16   : > { %s281_s28 = scalar_lea.vmem [#allocation5], %s1558_s23  ;;  %s287_s17 = sshll.u32 %s286_s27, 4  ;;  %s288_s17 = int_to_ptr.hbm [resolvable:$true] %s287_s17 }
  0x17   : > { %s289_s0 = sshll.u32 %s281_s28, 4  ;;  %p1648_p0 = pnand %p1655_p13, %p2121_p4  ;;  %s290_s0 = int_to_ptr.vmem [resolvable:$true] %s289_s0 }
  0x18   : > { %p1561_p1 = scmp.ge.s32.totalorder %s2025_s12, 1  ;;  %s278_s13 = scalar_lea.sflag [#allocation6], %s277_s22 }
  0x19   : > { %s2027_s15 = smov 256   ;;  %s2028_s14 = smov 16  }
  0x1a   : > { %1650 = dma.hbm_to_vmem [thread:$0]  (!%p1648_p0), %s288_s17, 1024, %s290_s0, %s278_s13, %s2027_s15, %s2027_s15, %s2028_s14  }
  0x1b   : > { %p297_p2 = scmp.lt.s32.totalorder %s2025_s12, 3 }
  0x1d   : > { %p298_p3 = pnand %p1561_p1, %p297_p2 }
  0x1f   : > { %301 = sbr.rel (%p298_p3) target bundleno = 1341 (0x53d), region = 52 }
  0x24   : > { %s2154_s11 = sand.u32 1, %s2009_s30  }
  0x25   : > { %s1562_s23 = sshll.u32 %s2154_s11, 6  ;;  %s304_s24 = scalar_lea.sflag [#allocation6], %s2154_s11 }
  0x26   : > { %s2160_s16 = scalar_lea.vmem [#allocation5], %s1562_s23 }
  0x27   : > { %1996 = dma.done.wait (%p2127_p8), %s304_s24, 1024  }
  0x28   : > { %1998 = vsyncadd (%p2127_p8), %s304_s24, 4294966272  ;;  %v2029_v0 = vmov 0   ;;  %v351_v1 = vld [vmem:[%s2160_s16 + $0x20] sm:$0xff]  ;;  %v353_v2 = vld [vmem:[%s2160_s16 + $0x30] sm:$0xff]  ;;  %vm366_vm0 = vcmask 261120   ;;  %vm481_vm1 = vcmask 1041408  }
  0x29   : > { %1710 = vset.pattern.permute.xlu0 %v2029_v0  ;;  %1711 = vset.pattern.permute.xlu2 %v2029_v0  ;;  %v352_v3 = vld [vmem:[%s2160_s16 + $0x28] sm:$0xff]  ;;  %v357_v4 = vpack.c.bf16 %v353_v2, %v351_v1  ;;  %v354_v5 = vld [vmem:[%s2160_s16 + $0x38] sm:$0xff]  ;;  %v347_v6 = vld [vmem:[%s2160_s16] sm:$0xff]  ;;  %vm580_vm2 = vcmask 31744   ;;  %s1424_s17 = sld [smem:[#allocation4]]  ;;  %s2966_s13 = scalar_lea.vmem [#allocation8], %s1562_s23 }
  0x2a   : > { %v349_v7 = vld [vmem:[%s2160_s16 + $0x10] sm:$0xff]  ;;  %v358_v8 = vpack.c.bf16 %v354_v5, %v352_v3  ;;  %v348_v9 = vld [vmem:[%s2160_s16 + $0x8] sm:$0xff]  ;;  %v350_v10 = vld [vmem:[%s2160_s16 + $0x18] sm:$0xff]  ;;  %s1640_s23 = sshll.u32 %s2017_s10, 6  ;;  %s1465_s18 = sshll.u32 %s2966_s13, 4  ;;  %s1466_s18 = int_to_ptr.vmem [resolvable:$true] %s1465_s18 }
  0x2b   : > { %376 = vmatpush.bf16.msra.mxu2 %v357_v4  ;;  %v355_v11 = vpack.c.bf16 %v349_v7, %v347_v6  ;;  %529 = vmatpush.bf16.msra.mxu0 %v357_v4  ;;  %v360_v12 = vld [vmem:[%s3027_s5] sm:$0xf]  ;;  %v356_v13 = vpack.c.bf16 %v350_v10, %v348_v9  ;;  %v1635_v43 = vld [vmem:[%s3028_s6 + $0x8] sm:$0xff]  ;;  %s1464_s14 = scalar_lea.hbm %s3030_s8, %s1640_s23  ;;  %s1451_s10 = scalar_lea.sflag [#allocation7], %s2154_s11 }
  0x2c   : > { %389 = vmatpush.bf16.msra.mxu1 %v358_v8  ;;  %363 = vperm.xlu0 %1710, %v360_v12   ;;  %v359_v14 = vld [vmem:[%s3026_s4] sm:$0x3]  ;;  %s1467_s22 = sshll.u32 %s1464_s14, 4  ;;  %s1963_s0 = scalar_lea.hbm %s3030_s8, 128  ;;  %s1468_s22 = int_to_ptr.hbm [resolvable:$true] %s1467_s22 }
  0x2d   : > { %465 = vmatpush.bf16.msra.mxu3 %v358_v8  ;;  %v508_v15 = vld [vmem:[%s3024_s2] sm:$0x3]  ;;  %s1957_s25 = sshra.s32 %s1468_s22, 4  ;;  %s1958_s25 = int_to_ptr.hbm [resolvable:$true] %s1957_s25 }
  0x2e   : > { %v513_v16 = vld [vmem:[%s3025_s3] sm:$0xf]  ;;  %s1959_s26 = scalar_lea.hbm %s1958_s25, 64  ;;  %p1964_p7 = scmp.lt.s32.totalorder %s1958_s25, %s3030_s8 }
  0x2f   : > { %377 = vmatpush.bf16.msra.mxu2 %v355_v11  ;;  %530 = vmatpush.bf16.msra.mxu0 %v355_v11  ;;  %v1634_v41 = vld [vmem:[%s3028_s6] sm:$0xff]  ;;  %p1960_p4 = scmp.ne.s32.totalorder %s1958_s25, %s1959_s26  ;;  %p1965_p8 = scmp.lt.s32.totalorder %s1963_s0, %s1959_s26 }
  0x30   : > { %390 = vmatpush.bf16.msra.mxu1 %v356_v13 }
  0x31   : > { %466 = vmatpush.bf16.msra.mxu3 %v356_v13  ;;  %p1961_p5 = pnand %p1960_p4, %p2131_p9  ;;  %p1966_p10 = por %p1965_p8, %p1964_p7 }
  0x32   : > { %1564 = vmatmul.msk.bf16.vlgmr.msra.gmra.mxu2 %vm366_vm0, %v359_v14  ;;  %1578 = vmatmul.msk.bf16.vlgmr.msra.gmra.mxu0 %vm366_vm0, %v508_v15 }
  0x33   : > { %446 = vmatpush.bf16.msrb.mxu2 %v357_v4  ;;  %1565 = vmatmul.msk.bf16.vlgmr.msra.gmra.mxu1 %vm366_vm0, %v359_v14  ;;  %p1962_p6 = pneg %p1961_p5 }
  0x34   : > { %542 = vmatpush.bf16.msrb.mxu1 %v358_v8  ;;  %516 = vperm.xlu0 %1710, %v513_v16  }
  0x35   : > { %1576 = vmatmul.msk.bf16.vlgmr.msra.gmra.mxu3 %vm366_vm0, %v1634_v41  ;;  %p1967_p13 = pnand %p1966_p10, %p1962_p6 }
  0x37   : > { %447 = vmatpush.bf16.msrb.mxu2 %v355_v11 }
  0x38   : > { %543 = vmatpush.bf16.msrb.mxu1 %v356_v13 }
  0x42   : > { %1574 = vmatmul.msk.bf16.vlgmr.msrb.gmra.mxu2 %vm366_vm0, %v1634_v41 }
  0x43   : > { %1579 = vmatmul.msk.bf16.vlgmr.msrb.gmra.mxu1 %vm366_vm0, %v508_v15 }
  0x45   : > { %1577 = vmatmul.msk.bf16.gmra.mxu3 %vm366_vm0, %v1635_v43 }
  0x52   : > { %1575 = vmatmul.msk.bf16.gmra.mxu2 %vm366_vm0, %v1635_v43 }
  0x9e   : > { %v364_v19 = vpop.permute.xlu0 %363 }
  0xa6   : > { %v517_v27 = vpop.permute.xlu0 %516 }
  0xaf   : > { %v532_v17 = vpop.f32.mrf.mxu0 }
  0xb0   : > { %v392_v18 = vpop.f32.mrf.mxu1  ;;  %v533_v30 = vadd.f32 %v532_v17, %v517_v27 }
  0xb1   : > { %v393_v21 = vadd.f32 %v392_v18, %v364_v19 }
  0xb2   : > { %v549_v34 = vpack.c.bf16 %v533_v30, %v533_v30 }
  0xb5   : > { %v379_v20 = vpop.f32.mrf.mxu2 }
  0xb6   : > { %v380_v22 = vadd.f32 %v379_v20, %v364_v19 }
  0xb7   : > { %v534_v23 = vpop.f32.mrf.mxu0 }
  0xb8   : > { %v478_v24 = vpack.c.bf16 %v393_v21, %v380_v22  ;;  %v394_v25 = vpop.f32.mrf.mxu1  ;;  %v2247_v1 = vpop.f32.mrf.mxu3 }
  0xb9   : > { %3075 = vst [vmem:[#allocation13_spill] sm:$0xff] %v2247_v1 }
  0xba   : > { %v480_v26 = vrot.slane %v478_v24, 2 }
  0xbc   : > { %v484_v28 = vsel %vm481_vm1, %v478_v24, %v480_v26 }
  0xbd   : > { %486 = vst [vmem:[#allocation2] sm:$0xf] %v484_v28  ;;  %v381_v29 = vpop.f32.mrf.mxu2 }
  0xc0   : > { %v545_v31 = vpop.f32.mrf.mxu1  ;;  %v2253_v4 = vpop.f32.mrf.mxu3 }
  0xc1   : > { %v546_v32 = vadd.f32 %v545_v31, %v517_v27  ;;  %3076 = vst [vmem:[#allocation14_spill] sm:$0xff] %v2253_v4 }
  0xc3   : > { %v550_v33 = vpack.c.bf16 %v546_v32, %v546_v32 }
  0xc4   : > { %v551_v35 = vld [vmem:[#allocation2] sm:$0xf] }
  0xc5   : > { %552 = vxpose.binary.xlu1.c.b16.start.end [1/2] (short) %v550_v33, %v549_v34, 128  ;;  %577 = vst [vmem:[#allocation1] ss:$4 sm:$0xff] %v551_v35  ;;  %v2261_v7 = vpop.f32.mrf.mxu2 }
  0xc6   : > { %3077 = vst [vmem:[#allocation15_spill] sm:$0xff] %v2261_v7 }
  0xc8   : > { %v547_v36 = vpop.f32.mrf.mxu1  ;;  %v2267_v10 = vpop.f32.mrf.mxu3 }
  0xc9   : > { %3078 = vst [vmem:[#allocation16_spill] sm:$0xff] %v2267_v10 }
  0xcc   : > { %v578_v37 = vld.sshfl [vmem:[#allocation1] sm:$0xff pattern:$0x73625140]  ;;  %v579_v38 = vld.sshfl [vmem:[#allocation1 + $0x8] sm:$0xff pattern:$0x73625140] }
  0xcd   : > { %v630_v39 = vsel %vm481_vm1, %v578_v37, 0  ;;  %v632_v40 = vsel %vm481_vm1, %v579_v38, 0  ;;  %v2269_v11 = vpop.f32.mrf.mxu2 }
  0xce   : > { %641 = vmatpush.bf16.msrb.mxu0 %v630_v39  ;;  %1641 = vmatpush.bf16.msra.mxu2 %v630_v39  ;;  %3079 = vst [vmem:[#allocation17_spill] sm:$0xff] %v2269_v11 }
  0xcf   : > { %730 = vmatpush.bf16.msra.mxu1 %v632_v40  ;;  %1642 = vmatpush.bf16.msrb.mxu3 %v632_v40 }
  0xd0   : > { %v2276_v14 = vpop.f32.mrf.mxu3 }
  0xd1   : > { %3080 = vst [vmem:[#allocation18_spill] sm:$0xff] %v2276_v14 }
  0xd5   : > { %v2282_v17 = vpop.f32.mrf.mxu2 }
  0xd6   : > { %3081 = vst [vmem:[#allocation19_spill] sm:$0xff] %v2282_v17 }
  0xdd   : > { %v2290_v21 = vpop.f32.mrf.mxu2 }
  0xde   : > { %3082 = vst [vmem:[#allocation20_spill] sm:$0xff] %v2290_v21 }
 0x118   : > { %1712 = vset.pattern.permute.xlu1 %v2029_v0 }
 0x171   : > { %v560_v42 = vpop.trf.xlu1 }
 0x172   : > { %1580 = vmatmul.msk.bf16.vlgmr.msrb.gmra.mxu0 %vm580_vm2, %v560_v42  ;;  %1596 = vmatmul.msk.bf16.vlgmr.msra.gmra.mxu1 %vm580_vm2, %v560_v42 }
 0x179   : > { %v561_v44 = vpop.trf.xlu1 }
 0x181   : > { %v562_v45 = vpop.trf.xlu1 }
 0x182   : > { %1581 = vmatmul.msk.bf16.gmra.mxu0 %vm580_vm2, %v562_v45  ;;  %1597 = vmatmul.msk.bf16.gmra.mxu1 %vm580_vm2, %v562_v45 }
 0x189   : > { %v563_v46 = vpop.trf.xlu1 }
 0x191   : > { %v564_v47 = vpop.trf.xlu1 }
 0x192   : > { %1582 = vmatmul.msk.bf16.gmra.mxu0 %vm580_vm2, %v564_v47  ;;  %1598 = vmatmul.msk.bf16.gmra.mxu1 %vm580_vm2, %v564_v47 }
 0x199   : > { %v565_v48 = vpop.trf.xlu1 }
 0x1a1   : > { %v566_v49 = vpop.trf.xlu1 }
 0x1a2   : > { %1583 = vmatmul.msk.bf16.gmra.mxu0 %vm580_vm2, %v566_v49  ;;  %1599 = vmatmul.msk.bf16.gmra.mxu1 %vm580_vm2, %v566_v49 }
 0x1a9   : > { %v567_v50 = vpop.trf.xlu1 }
 0x1aa   : > { %1607 = vmatmul.msk.bf16.vlgmr.msrb.gmra.mxu3 %vm580_vm2, %v567_v50 }
 0x1b1   : > { %v568_v51 = vpop.trf.xlu1 }
 0x1b2   : > { %1584 = vmatmul.msk.bf16.gmra.mxu0 %vm580_vm2, %v568_v51  ;;  %1600 = vmatmul.msk.bf16.gmra.mxu1 %vm580_vm2, %v568_v51 }
 0x1b9   : > { %v569_v52 = vpop.trf.xlu1 }
 0x1ba   : > { %1592 = vmatmul.msk.bf16.vlgmr.msra.gmra.mxu2 %vm580_vm2, %v569_v52  ;;  %1608 = vmatmul.msk.bf16.gmra.mxu3 %vm580_vm2, %v569_v52 }
 0x1c1   : > { %v570_v53 = vpop.trf.xlu1 }
 0x1c2   : > { %1585 = vmatmul.msk.bf16.gmra.mxu0 %vm580_vm2, %v570_v53  ;;  %1601 = vmatmul.msk.bf16.gmra.mxu1 %vm580_vm2, %v570_v53 }
 0x1c9   : > { %v571_v54 = vpop.trf.xlu1 }
 0x1ca   : > { %1593 = vmatmul.msk.bf16.gmra.mxu2 %vm580_vm2, %v571_v54  ;;  %1609 = vmatmul.msk.bf16.gmra.mxu3 %vm580_vm2, %v571_v54 }
 0x1d1   : > { %v572_v55 = vpop.trf.xlu1 }
 0x1d2   : > { %1586 = vmatmul.msk.bf16.gmra.mxu0 %vm580_vm2, %v572_v55  ;;  %1602 = vmatmul.msk.bf16.gmra.mxu1 %vm580_vm2, %v572_v55 }
 0x1d9   : > { %v573_v56 = vpop.trf.xlu1 }
 0x1da   : > { %1594 = vmatmul.msk.bf16.gmra.mxu2 %vm580_vm2, %v573_v56  ;;  %1610 = vmatmul.msk.bf16.gmra.mxu3 %vm580_vm2, %v573_v56 }
 0x1e1   : > { %v574_v57 = vpop.trf.xlu1 }
 0x1e2   : > { %1587 = vmatmul.msk.bf16.gmra.mxu0 %vm580_vm2, %v574_v57  ;;  %1603 = vmatmul.msk.bf16.gmra.mxu1 %vm580_vm2, %v574_v57 }
 0x1e9   : > { %v575_v58 = vpop.trf.xlu1 }
 0x1ea   : > { %1595 = vmatmul.msk.bf16.gmra.mxu2 %vm580_vm2, %v575_v58  ;;  %1611 = vmatmul.msk.bf16.gmra.mxu3 %vm580_vm2, %v575_v58 }
 0x1ef   : > { %v2231_v59 = vpop.f32.mrf.mxu0  ;;  %v2233_v60 = vpop.f32.mrf.mxu1 }
 0x1f2   : > { %1588 = vmatmul.msk.bf16.gmra.mxu0 %vm580_vm2, %v561_v44  ;;  %1604 = vmatmul.msk.bf16.gmra.mxu1 %vm580_vm2, %v561_v44 }
 0x1f7   : > { %v2237_v61 = vpop.f32.mrf.mxu0  ;;  %v2239_v62 = vpop.f32.mrf.mxu1 }
 0x1ff   : > { %v2241_v63 = vpop.f32.mrf.mxu0  ;;  %v2243_v0 = vpop.f32.mrf.mxu1 }
 0x200   : > { %v818_v54 = vmax.f32 %v2241_v63, %v2243_v0 }
 0x202   : > { %1589 = vmatmul.msk.bf16.gmra.mxu0 %vm580_vm2, %v563_v46  ;;  %1605 = vmatmul.msk.bf16.gmra.mxu1 %vm580_vm2, %v563_v46 }
 0x207   : > { %v2249_v2 = vpop.f32.mrf.mxu0  ;;  %v2251_v3 = vpop.f32.mrf.mxu1 }
 0x20f   : > { %v2255_v5 = vpop.f32.mrf.mxu0  ;;  %v2257_v6 = vpop.f32.mrf.mxu1 }
 0x210   : > { %v824_v45 = vmax.f32 %v2255_v5, %v2257_v6 }
 0x212   : > { %1590 = vmatmul.msk.bf16.gmra.mxu0 %vm580_vm2, %v565_v48  ;;  %1606 = vmatmul.msk.bf16.gmra.mxu1 %vm580_vm2, %v565_v48 }
 0x217   : > { %v2263_v8 = vpop.f32.mrf.mxu0  ;;  %v2265_v9 = vpop.f32.mrf.mxu1 }
 0x21f   : > { %v2271_v12 = vpop.f32.mrf.mxu0  ;;  %v2273_v13 = vpop.f32.mrf.mxu1 }
 0x220   : > { %v830_v55 = vmax.f32 %v2271_v12, %v2273_v13 }
 0x222   : > { %1591 = vmatmul.msk.bf16.gmra.mxu0 %vm580_vm2, %v567_v50 }
 0x227   : > { %v2278_v15 = vpop.f32.mrf.mxu0  ;;  %v2280_v16 = vpop.f32.mrf.mxu1 }
 0x22d   : > { %v2284_v18 = vpop.f32.mrf.mxu3 }
 0x22f   : > { %v2286_v19 = vpop.f32.mrf.mxu0  ;;  %v2288_v20 = vpop.f32.mrf.mxu1 }
 0x230   : > { %v836_v52 = vmax.f32 %v2286_v19, %v2288_v20 }
 0x235   : > { %v2292_v22 = vpop.f32.mrf.mxu3 }
 0x237   : > { %v2294_v23 = vpop.f32.mrf.mxu0  ;;  %v2296_v24 = vpop.f32.mrf.mxu1 }
 0x238   : > { %v839_v53 = vmax.f32 %v2294_v23, %v2296_v24 }
 0x23d   : > { %v2298_v25 = vpop.f32.mrf.mxu2  ;;  %v2300_v26 = vpop.f32.mrf.mxu3 }
 0x23f   : > { %v2302_v27 = vpop.f32.mrf.mxu0  ;;  %v2304_v28 = vpop.f32.mrf.mxu1 }
 0x240   : > { %v842_v40 = vmax.f32 %v2302_v27, %v2304_v28 }
 0x245   : > { %v2306_v29 = vpop.f32.mrf.mxu2  ;;  %v2308_v30 = vpop.f32.mrf.mxu3 }
 0x246   : > { %v887_v10 = vmax.f32 %v2306_v29, %v2308_v30 }
 0x247   : > { %v2310_v31 = vpop.f32.mrf.mxu0  ;;  %v2312_v32 = vpop.f32.mrf.mxu1 }
 0x248   : > { %v845_v44 = vmax.f32 %v2310_v31, %v2312_v32 }
 0x24d   : > { %v2320_v36 = vpop.f32.mrf.mxu2  ;;  %v2322_v37 = vpop.f32.mrf.mxu3 }
 0x24e   : > { %3083 = vst [vmem:[#allocation21_spill] sm:$0xff] %v2322_v37  ;;  %v890_v56 = vmax.f32 %v2320_v36, %v2322_v37 }
 0x24f   : > { %v2314_v33 = vpop.f32.mrf.mxu0  ;;  %v2316_v34 = vpop.f32.mrf.mxu1 }
 0x250   : > { %v848_v35 = vmax.f32 %v2314_v33, %v2316_v34 }
 0x252   : > { %849 = vmax.xlane.f32.xlu2 %v848_v35  ;;  %v833_v35 = vmax.f32 %v2278_v15, %v2280_v16 }
 0x255   : > { %v2332_v42 = vpop.f32.mrf.mxu2  ;;  %v2334_v43 = vpop.f32.mrf.mxu3 }
 0x257   : > { %v2324_v38 = vpop.f32.mrf.mxu0  ;;  %v2326_v39 = vpop.f32.mrf.mxu1 }
 0x258   : > { %3084 = vst [vmem:[#allocation22_spill] sm:$0xff] %v2324_v38  ;;  %v851_v41 = vmax.f32 %v2324_v38, %v2326_v39 }
 0x259   : > { %3085 = vst [vmem:[#allocation23_spill] sm:$0xff] %v2326_v39 }
 0x25a   : > { %843 = vmax.xlane.f32.xlu2 %v842_v40  ;;  %852 = vmax.xlane.f32.xlu0 %v851_v41  ;;  %v812_v40 = vmax.f32 %v2231_v59, %v2233_v60 }
 0x25d   : > { %v2346_v49 = vpop.f32.mrf.mxu2  ;;  %v2348_v50 = vpop.f32.mrf.mxu3 }
 0x25e   : > { %v896_v51 = vmax.f32 %v2346_v49, %v2348_v50 }
 0x25f   : > { %v2340_v46 = vpop.f32.mrf.mxu0  ;;  %v2342_v47 = vpop.f32.mrf.mxu1 }
 0x260   : > { %v854_v48 = vmax.f32 %v2340_v46, %v2342_v47 }
 0x262   : > { %846 = vmax.xlane.f32.xlu2 %v845_v44  ;;  %825 = vmax.xlane.f32.xlu0 %v824_v45  ;;  %v827_v45 = vmax.f32 %v2263_v8, %v2265_v9 }
 0x263   : > { %855 = vmax.xlane.f32.xlu1 %v854_v48  ;;  %v884_v48 = vmax.f32 %v2298_v25, %v2300_v26 }
 0x265   : > { %v2370_v41 = vpop.f32.mrf.mxu2  ;;  %v2372_v44 = vpop.f32.mrf.mxu3 }
 0x266   : > { %3088 = vst [vmem:[#allocation26_spill] sm:$0xff] %v2370_v41 }
 0x267   : > { %v2362_v57 = vpop.f32.mrf.mxu0  ;;  %v2364_v58 = vpop.f32.mrf.mxu1  ;;  %3089 = vst [vmem:[#allocation27_spill] sm:$0xff] %v2372_v44 }
 0x268   : > { %3086 = vst [vmem:[#allocation24_spill] sm:$0xff] %v2362_v57 }
 0x269   : > { %3087 = vst [vmem:[#allocation25_spill] sm:$0xff] %v2364_v58 }
 0x26a   : > { %837 = vmax.xlane.f32.xlu2 %v836_v52  ;;  %897 = vmax.xlane.f32.xlu0 %v896_v51 }
 0x26f   : > { %v2378_v51 = vpop.f32.mrf.mxu0  ;;  %v2380_v52 = vpop.f32.mrf.mxu1 }
 0x270   : > { %3090 = vst [vmem:[#allocation28_spill] sm:$0xff] %v2378_v51 }
 0x271   : > { %3091 = vst [vmem:[#allocation29_spill] sm:$0xff] %v2380_v52 }
 0x272   : > { %840 = vmax.xlane.f32.xlu2 %v839_v53  ;;  %819 = vmax.xlane.f32.xlu0 %v818_v54  ;;  %v2382_v53 = vpop.f32.mrf.mxu2  ;;  %v2384_v54 = vpop.f32.mrf.mxu3 }
 0x27a   : > { %831 = vmax.xlane.f32.xlu2 %v830_v55  ;;  %891 = vmax.xlane.f32.xlu0 %v890_v56  ;;  %v902_v55 = vmax.f32 %v2382_v53, %v2384_v54  ;;  %v821_v56 = vmax.f32 %v2249_v2, %v2251_v3  ;;  %v2412_v17 = vpop.f32.mrf.mxu2  ;;  %v2414_v1 = vpop.f32.mrf.mxu3 }
 0x27b   : > { %3096 = vst [vmem:[#allocation34_spill] sm:$0xff] %v2412_v17 }
 0x27c   : > { %3097 = vst [vmem:[#allocation35_spill] sm:$0xff] %v2414_v1 }
 0x282   : > { %834 = vmax.xlane.f32.xlu2 %v833_v35  ;;  %813 = vmax.xlane.f32.xlu0 %v812_v40  ;;  %v2390_v35 = vpop.f32.mrf.mxu0  ;;  %v2392_v40 = vpop.f32.mrf.mxu1 }
 0x283   : > { %3092 = vst [vmem:[#allocation30_spill] sm:$0xff] %v2390_v35 }
 0x284   : > { %3093 = vst [vmem:[#allocation31_spill] sm:$0xff] %v2392_v40 }
 0x28a   : > { %828 = vmax.xlane.f32.xlu2 %v827_v45  ;;  %885 = vmax.xlane.f32.xlu0 %v884_v48  ;;  %v893_v45 = vmax.f32 %v2332_v42, %v2334_v43  ;;  %v860_v48 = vmax.f32 %v2378_v51, %v2380_v52  ;;  %v2398_v14 = vpop.f32.mrf.mxu0  ;;  %v2400_v21 = vpop.f32.mrf.mxu1 }
 0x28b   : > { %3094 = vst [vmem:[#allocation32_spill] sm:$0xff] %v2398_v14 }
 0x28c   : > { %3095 = vst [vmem:[#allocation33_spill] sm:$0xff] %v2400_v21 }
 0x292   : > { %822 = vmax.xlane.f32.xlu2 %v821_v56  ;;  %903 = vmax.xlane.f32.xlu0 %v902_v55  ;;  %v815_v56 = vmax.f32 %v2237_v61, %v2239_v62  ;;  %v866_v55 = vmax.f32 %v2398_v14, %v2400_v21 }
 0x29a   : > { %894 = vmax.xlane.f32.xlu2 %v893_v45  ;;  %861 = vmax.xlane.f32.xlu0 %v860_v48  ;;  %v899_v45 = vmax.f32 %v2370_v41, %v2372_v44  ;;  %v857_v48 = vmax.f32 %v2362_v57, %v2364_v58  ;;  %v2440_v58 = vpop.f32.mrf.mxu1 }
 0x2a2   : > { %816 = vmax.xlane.f32.xlu2 %v815_v56  ;;  %867 = vmax.xlane.f32.xlu0 %v866_v55  ;;  %v905_v56 = vmax.f32 %v2412_v17, %v2414_v1 }
 0x2aa   : > { %888 = vmax.xlane.f32.xlu2 %v887_v10  ;;  %v863_v10 = vmax.f32 %v2390_v35, %v2392_v40  ;;  %v2436_v35 = vpop.f32.mrf.mxu0 }
 0x2b2   : > { %900 = vmax.xlane.f32.xlu2 %v899_v45 }
 0x2ba   : > { %858 = vmax.xlane.f32.xlu2 %v857_v48 }
 0x2c2   : > { %906 = vmax.xlane.f32.xlu2 %v905_v56 }
 0x2c5   : > { %v2418_v55 = vpop.xlane.xlu2 %849 }
 0x2ca   : > { %864 = vmax.xlane.f32.xlu2 %v863_v10 }
 0x2cd   : > { %v2422_v7 = vpop.xlane.xlu2 %843  ;;  %v2424_v45 = vpop.xlane.xlu0 %852 }
 0x2ce   : > { %3098 = vst [vmem:[#allocation36_spill] sm:$0xff] %v2424_v45  ;;  %v2456_v45 = vpop.f32.mrf.mxu1 }
 0x2d5   : > { %v2426_v21 = vpop.xlane.xlu2 %846  ;;  %v826_v48 = vpop.xlane.xlu0 %825 }
 0x2d6   : > { %v916_v44 = vsub.f32 %v2255_v5, %v826_v48 }
 0x2dd   : > { %v2428_v14 = vpop.xlane.xlu2 %837  ;;  %v2430_v4 = vpop.xlane.xlu0 %897 }
 0x2e5   : > { %v2432_v11 = vpop.xlane.xlu2 %840  ;;  %v820_v56 = vpop.xlane.xlu0 %819 }
 0x2e6   : > { %v912_v1 = vsub.f32 %v2241_v63, %v820_v56  ;;  %v913_v17 = vsub.f32 %v2243_v0, %v820_v56  ;;  %v917_v63 = vsub.f32 %v2257_v6, %v826_v48  ;;  %v2448_v0 = vpop.f32.mrf.mxu0  ;;  %v988_v56 = vmul.f32 1.442695, %v916_v44 }
 0x2e7   : > { %v872_v6 = vmax.f32 %v2448_v0, %v2456_v45 }
 0x2e8   : > { %v980_v40 = vmul.f32 1.442695, %v912_v1  ;;  %v982_v10 = vmul.f32 1.442695, %v913_v17  ;;  %v990_v38 = vmul.f32 1.442695, %v917_v63 }
 0x2ea   : > { %1713 = vpow2.f32 %v980_v40 }
 0x2eb   : > { %1715 = vpow2.f32 %v982_v10 }
 0x2ec   : > { %1717 = vpow2.f32 %v988_v56 }
 0x2ed   : > { %v832_v52 = vpop.xlane.xlu2 %831  ;;  %v2438_v51 = vpop.xlane.xlu0 %891  ;;  %1719 = vpow2.f32 %v990_v38 }
 0x2ee   : > { %v2462_v44 = vpop.f32.mrf.mxu0 }
 0x2f0   : > { %v2442_v57 = vpop.eup %1713 }
 0x2f1   : > { %3099 = vst [vmem:[#allocation37_spill] sm:$0xff] %v2442_v57  ;;  %v2445_v41 = vpop.eup %1715 }
 0x2f2   : > { %3100 = vst [vmem:[#allocation38_spill] sm:$0xff] %v2445_v41  ;;  %v1106_v1 = vadd.f32 %v2445_v41, %v2442_v57 }
 0x2f4   : > { %1107 = vadd.xlane.f32.xlu0 %v1106_v1 }
 0x2f5   : > { %v2452_v17 = vpop.xlane.xlu2 %834  ;;  %v814_v40 = vpop.xlane.xlu0 %813 }
 0x2f6   : > { %v908_v10 = vsub.f32 %v2231_v59, %v814_v40  ;;  %v909_v39 = vsub.f32 %v2233_v60, %v814_v40  ;;  %v2464_v59 = vpop.eup %1717  ;;  %v920_v60 = vsub.f32 %v2271_v12, %v832_v52  ;;  %v2480_v41 = vpop.f32.mrf.mxu0 }
 0x2f7   : > { %v2467_v63 = vpop.eup %1719 }
 0x2f8   : > { %v972_v5 = vmul.f32 1.442695, %v908_v10  ;;  %v974_v37 = vmul.f32 1.442695, %v909_v39  ;;  %v921_v39 = vsub.f32 %v2273_v13, %v832_v52  ;;  %v996_v40 = vmul.f32 1.442695, %v920_v60 }
 0x2f9   : > { %v1112_v56 = vadd.f32 %v2467_v63, %v2464_v59  ;;  %v924_v60 = vsub.f32 %v2286_v19, %v2428_v14 }
 0x2fa   : > { %1721 = vpow2.f32 %v972_v5  ;;  %v998_v10 = vmul.f32 1.442695, %v921_v39  ;;  %v925_v39 = vsub.f32 %v2288_v20, %v2428_v14 }
 0x2fb   : > { %1723 = vpow2.f32 %v974_v37 }
 0x2fc   : > { %873 = vmax.xlane.f32.xlu0 %v872_v6  ;;  %1725 = vpow2.f32 %v996_v40  ;;  %v1004_v40 = vmul.f32 1.442695, %v924_v60 }
 0x2fd   : > { %v2460_v48 = vpop.xlane.xlu2 %828  ;;  %1727 = vpow2.f32 %v998_v10  ;;  %v1006_v10 = vmul.f32 1.442695, %v925_v39 }
 0x300   : > { %v2470_v1 = vpop.eup %1721 }
 0x301   : > { %3101 = vst [vmem:[#allocation39_spill] sm:$0xff] %v2470_v1  ;;  %v2472_v38 = vpop.eup %1723 }
 0x302   : > { %3102 = vst [vmem:[#allocation40_spill] sm:$0xff] %v2472_v38  ;;  %v1100_v37 = vadd.f32 %v2472_v38, %v2470_v1 }
 0x304   : > { %1101 = vadd.xlane.f32.xlu1 %v1100_v37  ;;  %1113 = vadd.xlane.f32.xlu0 %v1112_v56  ;;  %v878_v37 = vmax.f32 %v2480_v41, %v2284_v18 }
 0x305   : > { %v823_v5 = vpop.xlane.xlu2 %822 }
 0x306   : > { %v914_v12 = vsub.f32 %v2249_v2, %v823_v5  ;;  %v915_v6 = vsub.f32 %v2251_v3, %v823_v5  ;;  %v886_v2 = vpop.xlane.xlu0 %885  ;;  %v2490_v3 = vpop.eup %1725 }
 0x307   : > { %v2492_v5 = vpop.eup %1727  ;;  %v956_v19 = vsub.f32 %v2298_v25, %v886_v2  ;;  %v957_v14 = vsub.f32 %v2300_v26, %v886_v2  ;;  %v928_v26 = vsub.f32 %v2302_v27, %v2422_v7 }
 0x308   : > { %v984_v13 = vmul.f32 1.442695, %v914_v12  ;;  %v986_v52 = vmul.f32 1.442695, %v915_v6 }
 0x309   : > { %v1070_v60 = vmul.f32 1.442695, %v957_v14  ;;  %v1012_v14 = vmul.f32 1.442695, %v928_v26 }
 0x30a   : > { %1729 = vpow2.f32 %v984_v13  ;;  %v1068_v13 = vmul.f32 1.442695, %v956_v19  ;;  %v929_v19 = vsub.f32 %v2304_v28, %v2422_v7 }
 0x30b   : > { %1731 = vpow2.f32 %v986_v52  ;;  %v1118_v52 = vadd.f32 %v2492_v5, %v2490_v3 }
 0x30c   : > { %879 = vmax.xlane.f32.xlu0 %v878_v37  ;;  %1733 = vpow2.f32 %v1004_v40 }
 0x30d   : > { %v2488_v56 = vpop.xlane.xlu2 %894  ;;  %1735 = vpow2.f32 %v1006_v10 }
 0x30e   : > { %1737 = vpow2.f32 %v1068_v13 }
 0x30f   : > { %1739 = vpow2.f32 %v1070_v60 }
 0x310   : > { %v2494_v12 = vpop.eup %1729 }
 0x311   : > { %3103 = vst [vmem:[#allocation41_spill] sm:$0xff] %v2494_v12  ;;  %v2497_v6 = vpop.eup %1731 }
 0x312   : > { %3104 = vst [vmem:[#allocation42_spill] sm:$0xff] %v2497_v6  ;;  %v1109_v20 = vadd.f32 %v2497_v6, %v2494_v12  ;;  %v2506_v38 = vpop.eup %1733 }
 0x313   : > { %v2510_v10 = vpop.eup %1735 }
 0x314   : > { %1110 = vadd.xlane.f32.xlu1 %v1109_v20  ;;  %1119 = vadd.xlane.f32.xlu0 %v1118_v52  ;;  %v2516_v52 = vpop.eup %1737 }
 0x315   : > { %v817_v39 = vpop.xlane.xlu2 %816  ;;  %3105 = vst [vmem:[#allocation43_spill] sm:$0xff] %v2516_v52 }
 0x316   : > { %v910_v37 = vsub.f32 %v2237_v61, %v817_v39  ;;  %v911_v25 = vsub.f32 %v2239_v62, %v817_v39  ;;  %v1124_v61 = vadd.f32 %v2510_v10, %v2506_v38  ;;  %v1014_v62 = vmul.f32 1.442695, %v929_v19  ;;  %v2520_v39 = vpop.eup %1739 }
 0x317   : > { %3106 = vst [vmem:[#allocation44_spill] sm:$0xff] %v2520_v39 }
 0x318   : > { %v976_v2 = vmul.f32 1.442695, %v910_v37  ;;  %v978_v40 = vmul.f32 1.442695, %v911_v25  ;;  %v932_v25 = vsub.f32 %v2314_v33, %v2418_v55 }
 0x31a   : > { %1741 = vpow2.f32 %v976_v2 }
 0x31b   : > { %1743 = vpow2.f32 %v978_v40  ;;  %v1020_v40 = vmul.f32 1.442695, %v932_v25 }
 0x31c   : > { %1125 = vadd.xlane.f32.xlu0 %v1124_v61  ;;  %1745 = vpow2.f32 %v1012_v14  ;;  %v918_v61 = vsub.f32 %v2263_v8, %v2460_v48 }
 0x31d   : > { %v889_v20 = vpop.xlane.xlu2 %888  ;;  %1747 = vpow2.f32 %v1014_v62 }
 0x31e   : > { %v958_v27 = vsub.f32 %v2306_v29, %v889_v20  ;;  %v959_v13 = vsub.f32 %v2308_v30, %v889_v20  ;;  %v933_v29 = vsub.f32 %v2316_v34, %v2418_v55  ;;  %v1172_v30 = vadd.f32 %v2520_v39, %v2516_v52 }
 0x31f   : > { %v919_v34 = vsub.f32 %v2265_v9, %v2460_v48  ;;  %v962_v55 = vsub.f32 %v2332_v42, %v2488_v56  ;;  %v992_v8 = vmul.f32 1.442695, %v918_v61  ;;  %v2556_v42 = vpop.f32.mrf.mxu1 }
 0x320   : > { %v2522_v37 = vpop.eup %1741  ;;  %v1072_v7 = vmul.f32 1.442695, %v958_v27  ;;  %v1074_v28 = vmul.f32 1.442695, %v959_v13  ;;  %v1022_v14 = vmul.f32 1.442695, %v933_v29  ;;  %v869_v27 = vmax.f32 %v2436_v35, %v2440_v58 }
 0x321   : > { %3107 = vst [vmem:[#allocation45_spill] sm:$0xff] %v2522_v37  ;;  %v2524_v60 = vpop.eup %1743  ;;  %v963_v13 = vsub.f32 %v2334_v43, %v2488_v56  ;;  %v994_v48 = vmul.f32 1.442695, %v919_v34  ;;  %v875_v43 = vmax.f32 %v2462_v44, %v2556_v42  ;;  %v964_v56 = vsub.f32 %v2346_v49, %v2430_v4 }
 0x322   : > { %3108 = vst [vmem:[#allocation46_spill] sm:$0xff] %v2524_v60  ;;  %1749 = vpow2.f32 %v1072_v7  ;;  %v1103_v26 = vadd.f32 %v2524_v60, %v2522_v37  ;;  %v2534_v2 = vpop.eup %1745  ;;  %v1080_v7 = vmul.f32 1.442695, %v962_v55  ;;  %v965_v29 = vsub.f32 %v2348_v50, %v2430_v4  ;;  %v856_v55 = vpop.xlane.xlu1 %855 }
 0x323   : > { %1751 = vpow2.f32 %v1074_v28  ;;  %v2536_v19 = vpop.eup %1747  ;;  %v1082_v28 = vmul.f32 1.442695, %v963_v13  ;;  %v922_v49 = vsub.f32 %v2278_v15, %v2452_v17  ;;  %v923_v4 = vsub.f32 %v2280_v16, %v2452_v17 }
 0x324   : > { %1104 = vadd.xlane.f32.xlu2 %v1103_v26  ;;  %1173 = vadd.xlane.f32.xlu0 %v1172_v30  ;;  %1753 = vpow2.f32 %v1020_v40  ;;  %v1130_v9 = vadd.f32 %v2536_v19, %v2534_v2  ;;  %v1086_v34 = vmul.f32 1.442695, %v965_v29  ;;  %v936_v50 = vsub.f32 %v2340_v46, %v856_v55 }
 0x325   : > { %1755 = vpow2.f32 %v1022_v14  ;;  %v1084_v14 = vmul.f32 1.442695, %v964_v56  ;;  %v1002_v15 = vmul.f32 1.442695, %v923_v4  ;;  %v926_v46 = vsub.f32 %v2294_v23, %v2432_v11  ;;  %v904_v56 = vpop.xlane.xlu0 %903 }
 0x326   : > { %1757 = vpow2.f32 %v992_v8  ;;  %v937_v8 = vsub.f32 %v2342_v47, %v856_v55  ;;  %v927_v47 = vsub.f32 %v2296_v24, %v2432_v11 }
 0x327   : > { %1759 = vpow2.f32 %v994_v48 }
 0x328   : > { %v2538_v33 = vpop.eup %1749  ;;  %1761 = vpow2.f32 %v1080_v7  ;;  %v1028_v7 = vmul.f32 1.442695, %v936_v50  ;;  %v1030_v16 = vmul.f32 1.442695, %v937_v8  ;;  %v1010_v55 = vmul.f32 1.442695, %v927_v47 }
 0x329   : > { %3109 = vst [vmem:[#allocation47_spill] sm:$0xff] %v2538_v33  ;;  %v2542_v62 = vpop.eup %1751  ;;  %1763 = vpow2.f32 %v1082_v28  ;;  %v2588_v28 = vpop.f32.mrf.mxu0 }
 0x32a   : > { %3110 = vst [vmem:[#allocation48_spill] sm:$0xff] %v2542_v62  ;;  %v1175_v20 = vadd.f32 %v2542_v62, %v2538_v33  ;;  %v2558_v25 = vpop.eup %1753  ;;  %1765 = vpow2.f32 %v1084_v14  ;;  %v881_v29 = vmax.f32 %v2588_v28, %v2292_v22  ;;  %v969_v14 = vsub.f32 %v2384_v54, %v904_v56  ;;  %v3122_v33 = vld [vmem:[#allocation28_spill] sm:$0xff] }
 0x32b   : > { %v2560_v26 = vpop.eup %1755  ;;  %1767 = vpow2.f32 %v1086_v34  ;;  %v1008_v34 = vmul.f32 1.442695, %v926_v46  ;;  %v3113_v46 = vld [vmem:[#allocation21_spill] sm:$0xff] }
 0x32c   : > { %1176 = vadd.xlane.f32.xlu1 %v1175_v20  ;;  %870 = vmax.xlane.f32.xlu2 %v869_v27  ;;  %v1136_v30 = vadd.f32 %v2560_v26, %v2558_v25  ;;  %v2570_v40 = vpop.eup %1757  ;;  %v1094_v4 = vmul.f32 1.442695, %v969_v14  ;;  %v961_v47 = vsub.f32 %v3113_v46, %v2438_v51  ;;  %v3117_v46 = vld [vmem:[#allocation26_spill] sm:$0xff] }
 0x32d   : > { %1131 = vadd.xlane.f32.xlu0 %v1130_v9  ;;  %v2572_v61 = vpop.eup %1759  ;;  %v1000_v9 = vmul.f32 1.442695, %v922_v49 }
 0x32e   : > { %v2574_v20 = vpop.eup %1761  ;;  %v1115_v13 = vadd.f32 %v2572_v61, %v2570_v40  ;;  %v1078_v14 = vmul.f32 1.442695, %v961_v47 }
 0x32f   : > { %v2578_v27 = vpop.eup %1763  ;;  %1769 = vpow2.f32 %v1000_v9 }
 0x330   : > { %v1181_v48 = vadd.f32 %v2578_v27, %v2574_v20  ;;  %v2590_v17 = vpop.eup %1765  ;;  %1771 = vpow2.f32 %v1002_v15 }
 0x331   : > { %1773 = vpow2.f32 %v1028_v7 }
 0x332   : > { %1775 = vpow2.f32 %v1030_v16 }
 0x333   : > { %1777 = vpow2.f32 %v1008_v34 }
 0x334   : > { %876 = vmax.xlane.f32.xlu2 %v875_v43  ;;  %v2594_v43 = vpop.eup %1767  ;;  %1779 = vpow2.f32 %v1010_v55  ;;  %v3114_v55 = vld [vmem:[#allocation36_spill] sm:$0xff] }
 0x335   : > { %1137 = vadd.xlane.f32.xlu0 %v1136_v30  ;;  %v968_v30 = vsub.f32 %v2382_v53, %v904_v56  ;;  %v1184_v23 = vadd.f32 %v2594_v43, %v2590_v17  ;;  %v2604_v49 = vpop.eup %1769  ;;  %v930_v53 = vsub.f32 %v2310_v31, %v2426_v21 }
 0x336   : > { %v2606_v24 = vpop.eup %1771 }
 0x337   : > { %v1092_v11 = vmul.f32 1.442695, %v968_v30  ;;  %v2608_v50 = vpop.eup %1773  ;;  %v1121_v8 = vadd.f32 %v2606_v24, %v2604_v49  ;;  %v1016_v9 = vmul.f32 1.442695, %v930_v53 }
 0x338   : > { %v2612_v54 = vpop.eup %1775 }
 0x339   : > { %1781 = vpow2.f32 %v1092_v11  ;;  %v2620_v7 = vpop.eup %1777  ;;  %v3115_v11 = vld [vmem:[#allocation22_spill] sm:$0xff] }
 0x33a   : > { %1783 = vpow2.f32 %v1094_v4  ;;  %v2622_v31 = vpop.eup %1779  ;;  %v934_v4 = vsub.f32 %v3115_v11, %v3114_v55 }
 0x33b   : > { %1785 = vpow2.f32 %v1016_v9  ;;  %v1127_v56 = vadd.f32 %v2622_v31, %v2620_v7 }
 0x33c   : > { %1116 = vadd.xlane.f32.xlu2 %v1115_v13  ;;  %v931_v13 = vsub.f32 %v2312_v32, %v2426_v21  ;;  %v960_v21 = vsub.f32 %v2320_v36, %v2438_v51  ;;  %v862_v36 = vpop.xlane.xlu0 %861  ;;  %v3116_v51 = vld [vmem:[#allocation23_spill] sm:$0xff]  ;;  %v1024_v9 = vmul.f32 1.442695, %v934_v4 }
 0x33d   : > { %1182 = vadd.xlane.f32.xlu0 %v1181_v48  ;;  %v1142_v48 = vadd.f32 %v2612_v54, %v2608_v50  ;;  %v935_v53 = vsub.f32 %v3116_v51, %v3114_v55 }
 0x33e   : > { %v1018_v15 = vmul.f32 1.442695, %v931_v13 }
 0x33f   : > { %v2624_v16 = vpop.eup %1781 }
 0x340   : > { %3111 = vst [vmem:[#allocation49_spill] sm:$0xff] %v2624_v16  ;;  %v2628_v32 = vpop.eup %1783  ;;  %1787 = vpow2.f32 %v1018_v15 }
 0x341   : > { %3112 = vst [vmem:[#allocation50_spill] sm:$0xff] %v2628_v32  ;;  %v1190_v30 = vadd.f32 %v2628_v32, %v2624_v16  ;;  %v2636_v34 = vpop.eup %1785  ;;  %v940_v32 = vsub.f32 %v3122_v33, %v862_v36 }
 0x343   : > { %v1036_v60 = vmul.f32 1.442695, %v940_v32 }
 0x344   : > { %882 = vmax.xlane.f32.xlu2 %v881_v29  ;;  %v1076_v29 = vmul.f32 1.442695, %v960_v21 }
 0x345   : > { %1185 = vadd.xlane.f32.xlu0 %v1184_v23 }
 0x346   : > { %v2638_v23 = vpop.eup %1787  ;;  %1789 = vpow2.f32 %v1076_v29  ;;  %v3118_v29 = vld [vmem:[#allocation27_spill] sm:$0xff] }
 0x347   : > { %1791 = vpow2.f32 %v1078_v14  ;;  %v1133_v13 = vadd.f32 %v2638_v23, %v2636_v34 }
 0x348   : > { %1793 = vpow2.f32 %v1024_v9  ;;  %v3119_v9 = vld [vmem:[#allocation24_spill] sm:$0xff] }
 0x34c   : > { %1122 = vadd.xlane.f32.xlu2 %v1121_v8  ;;  %v901_v8 = vpop.xlane.xlu2 %900  ;;  %v2646_v15 = vpop.eup %1789 }
 0x34d   : > { %1143 = vadd.xlane.f32.xlu0 %v1142_v48  ;;  %v1026_v48 = vmul.f32 1.442695, %v935_v53  ;;  %v2648_v21 = vpop.eup %1791  ;;  %v966_v47 = vsub.f32 %v3117_v46, %v901_v8 }
 0x34e   : > { %v1178_v14 = vadd.f32 %v2648_v21, %v2646_v15  ;;  %v2656_v51 = vpop.eup %1793 }
 0x34f   : > { %1795 = vpow2.f32 %v1026_v48  ;;  %v1088_v55 = vmul.f32 1.442695, %v966_v47 }
 0x351   : > { %1797 = vpow2.f32 %v1088_v55 }
 0x354   : > { %1128 = vadd.xlane.f32.xlu2 %v1127_v56  ;;  %v2651_v56 = vpop.xlane.xlu0 %867  ;;  %v859_v4 = vpop.xlane.xlu2 %858 }
 0x355   : > { %1191 = vadd.xlane.f32.xlu0 %v1190_v30  ;;  %v967_v30 = vsub.f32 %v3118_v29, %v901_v8  ;;  %v2658_v53 = vpop.eup %1795  ;;  %v938_v48 = vsub.f32 %v3119_v9, %v859_v4  ;;  %v3120_v8 = vld [vmem:[#allocation25_spill] sm:$0xff] }
 0x356   : > { %v939_v46 = vsub.f32 %v3120_v8, %v859_v4  ;;  %v1139_v47 = vadd.f32 %v2658_v53, %v2656_v51 }
 0x357   : > { %v1090_v11 = vmul.f32 1.442695, %v967_v30  ;;  %v1032_v30 = vmul.f32 1.442695, %v938_v48  ;;  %v2669_v39 = vpop.eup %1797 }
 0x359   : > { %1799 = vpow2.f32 %v1090_v11 }
 0x35a   : > { %1801 = vpow2.f32 %v1032_v30 }
 0x35c   : > { %1134 = vadd.xlane.f32.xlu2 %v1133_v13  ;;  %v401_v13 = vld [vmem:[%s3029_s7 + $0x8] sm:$0xff]  ;;  %v907_v30 = vpop.xlane.xlu2 %906 }
 0x35f   : > { %v2671_v52 = vpop.eup %1799 }
 0x360   : > { %v1187_v11 = vadd.f32 %v2671_v52, %v2669_v39  ;;  %v2675_v4 = vpop.eup %1801 }
 0x364   : > { %1179 = vadd.xlane.f32.xlu2 %v1178_v14  ;;  %v1034_v14 = vmul.f32 1.442695, %v939_v46  ;;  %v865_v57 = vpop.xlane.xlu2 %864 }
 0x366   : > { %1803 = vpow2.f32 %v1034_v14 }
 0x367   : > { %v2665_v29 = vpop.xlane.xlu0 %1107 }
 0x368   : > { %3121 = vst [vmem:[#allocation21_spill] sm:$0xff] %v2665_v29 }
 0x369   : > { %411 = vperm.xlu0 %1710, %v401_v13  }
 0x36c   : > { %1140 = vadd.xlane.f32.xlu2 %v1139_v47  ;;  %v2677_v13 = vpop.eup %1803 }
 0x36d   : > { %v1145_v48 = vadd.f32 %v2677_v13, %v2675_v4 }
 0x36f   : > { %v874_v55 = vpop.xlane.xlu0 %873 }
 0x370   : > { %v948_v8 = vsub.f32 %v2448_v0, %v874_v55  ;;  %v949_v46 = vsub.f32 %v2456_v45, %v874_v55  ;;  %v3126_v45 = vld [vmem:[#allocation30_spill] sm:$0xff] }
 0x371   : > { %v942_v55 = vsub.f32 %v3126_v45, %v865_v57 }
 0x372   : > { %v1052_v14 = vmul.f32 1.442695, %v948_v8  ;;  %v1054_v62 = vmul.f32 1.442695, %v949_v46  ;;  %v3127_v8 = vld [vmem:[#allocation31_spill] sm:$0xff] }
 0x373   : > { %v943_v46 = vsub.f32 %v3127_v8, %v865_v57  ;;  %v1040_v32 = vmul.f32 1.442695, %v942_v55 }
 0x374   : > { %1188 = vadd.xlane.f32.xlu2 %v1187_v11  ;;  %1805 = vpow2.f32 %v1052_v14  ;;  %v3123_v11 = vld [vmem:[#allocation29_spill] sm:$0xff] }
 0x375   : > { %v941_v16 = vsub.f32 %v3123_v11, %v862_v36  ;;  %1807 = vpow2.f32 %v1054_v62  ;;  %v400_v62 = vld [vmem:[%s3029_s7] sm:$0xff]  ;;  %v1042_v36 = vmul.f32 1.442695, %v943_v46 }
 0x376   : > { %1809 = vpow2.f32 %v1036_v60 }
 0x377   : > { %v1114_v9 = vpop.xlane.xlu0 %1113  ;;  %v1038_v37 = vmul.f32 1.442695, %v941_v16 }
 0x379   : > { %1811 = vpow2.f32 %v1038_v37 }
 0x37a   : > { %1813 = vpow2.f32 %v1040_v32 }
 0x37b   : > { %1815 = vpow2.f32 %v1042_v36 }
 0x37c   : > { %1146 = vadd.xlane.f32.xlu2 %v1145_v48  ;;  %v2687_v48 = vpop.eup %1805 }
 0x37d   : > { %3124 = vst [vmem:[#allocation36_spill] sm:$0xff] %v2687_v48  ;;  %v2689_v0 = vpop.eup %1807 }
 0x37e   : > { %3125 = vst [vmem:[#allocation22_spill] sm:$0xff] %v2689_v0  ;;  %v1160_v16 = vadd.f32 %v2689_v0, %v2687_v48  ;;  %v2700_v14 = vpop.eup %1809 }
 0x37f   : > { %v880_v47 = vpop.xlane.xlu0 %879  ;;  %3128 = vst [vmem:[#allocation23_spill] sm:$0xff] %v2700_v14  ;;  %v2702_v60 = vpop.eup %1811 }
 0x380   : > { %3129 = vst [vmem:[#allocation26_spill] sm:$0xff] %v2702_v60  ;;  %v1148_v11 = vadd.f32 %v2702_v60, %v2700_v14  ;;  %v2710_v45 = vpop.eup %1813  ;;  %v952_v48 = vsub.f32 %v2480_v41, %v880_v47 }
 0x381   : > { %3132 = vst [vmem:[#allocation25_spill] sm:$0xff] %v2710_v45  ;;  %v2712_v55 = vpop.eup %1815 }
 0x382   : > { %3133 = vst [vmem:[#allocation28_spill] sm:$0xff] %v2712_v55 }
 0x387   : > { %v2685_v1 = vpop.xlane.xlu0 %1119 }
 0x38f   : > { %v2693_v33 = vpop.xlane.xlu0 %1125 }
 0x393   : > { %1161 = vadd.xlane.f32.xlu0 %v1160_v16  ;;  %v3134_v16 = vld [vmem:[#allocation34_spill] sm:$0xff] }
 0x394   : > { %406 = vperm.xlu2 %1711, %v400_v62   ;;  %v1151_v62 = vadd.f32 %v2712_v55, %v2710_v45  ;;  %v970_v32 = vsub.f32 %v3134_v16, %v907_v30  ;;  %v1060_v16 = vmul.f32 1.442695, %v952_v48 }
 0x396   : > { %v1096_v12 = vmul.f32 1.442695, %v970_v32 }
 0x397   : > { %v2704_v37 = vpop.xlane.xlu2 %1104  ;;  %v2706_v57 = vpop.xlane.xlu0 %1173 }
 0x398   : > { %3130 = vst [vmem:[#allocation27_spill] sm:$0xff] %v2704_v37  ;;  %v953_v37 = vsub.f32 %v2284_v18, %v880_v47 }
 0x399   : > { %3131 = vst [vmem:[#allocation24_spill] sm:$0xff] %v2706_v57 }
 0x39b   : > { %1149 = vadd.xlane.f32.xlu0 %v1148_v11  ;;  %v3135_v11 = vld [vmem:[#allocation35_spill] sm:$0xff] }
 0x39c   : > { %v971_v14 = vsub.f32 %v3135_v11, %v907_v30 }
 0x39f   : > { %v2714_v8 = vpop.xlane.xlu2 %870 }
 0x3a0   : > { %v2716_v46 = vpop.xlane.xlu0 %1131 }
 0x3a3   : > { %1152 = vadd.xlane.f32.xlu0 %v1151_v62  ;;  %v1098_v62 = vmul.f32 1.442695, %v971_v14 }
 0x3a7   : > { %v877_v36 = vpop.xlane.xlu2 %876 }
 0x3a8   : > { %v950_v0 = vsub.f32 %v2462_v44, %v877_v36  ;;  %v951_v60 = vsub.f32 %v2556_v42, %v877_v36  ;;  %v2726_v29 = vpop.xlane.xlu0 %1137  ;;  %v1062_v44 = vmul.f32 1.442695, %v953_v37 }
 0x3aa   : > { %v1056_v57 = vmul.f32 1.442695, %v950_v0  ;;  %v1058_v6 = vmul.f32 1.442695, %v951_v60 }
 0x3ac   : > { %1817 = vpow2.f32 %v1056_v57 }
 0x3ad   : > { %1819 = vpow2.f32 %v1058_v6 }
 0x3ae   : > { %1821 = vrcp.f32 %v1114_v9 }
 0x3af   : > { %1823 = vpow2.f32 %v1096_v12  ;;  %v1117_v55 = vpop.xlane.xlu2 %1116 }
 0x3b0   : > { %1825 = vrcp.f32 %v1117_v55  ;;  %v1183_v9 = vpop.xlane.xlu0 %1182 }
 0x3b1   : > { %1827 = vpow2.f32 %v1098_v62 }
 0x3b2   : > { %v2728_v42 = vpop.eup %1817  ;;  %1829 = vpow2.f32 %v1060_v16 }
 0x3b3   : > { %v2730_v41 = vpop.eup %1819  ;;  %1831 = vpow2.f32 %v1062_v44 }
 0x3b4   : > { %v1822_v30 = vpop.eup %1821  ;;  %v1163_v18 = vadd.f32 %v2730_v41, %v2728_v42 }
 0x3b5   : > { %v2734_v47 = vpop.eup %1823  ;;  %v2739_v0 = vmul.f32 %v1822_v30, %v2464_v59  ;;  %v2745_v60 = vmul.f32 %v1822_v30, %v2467_v63  ;;  %v3137_v59 = vld [vmem:[#allocation14_spill] sm:$0xff] }
 0x3b6   : > { %v1826_v6 = vpop.eup %1825  ;;  %1164 = vadd.xlane.f32.xlu1 %v1163_v18 }
 0x3b7   : > { %v2736_v12 = vpop.eup %1827  ;;  %v883_v48 = vpop.xlane.xlu2 %882  ;;  %v2742_v14 = vmul.f32 %v1826_v6, %v2570_v40  ;;  %v2748_v37 = vmul.f32 %v1826_v6, %v2572_v61 }
 0x3b8   : > { %v2750_v57 = vpop.eup %1829  ;;  %v954_v55 = vsub.f32 %v2588_v28, %v883_v48  ;;  %v955_v32 = vsub.f32 %v2292_v22, %v883_v48  ;;  %v1193_v61 = vadd.f32 %v2736_v12, %v2734_v47  ;;  %v1186_v28 = vpop.xlane.xlu0 %1185 }
 0x3b9   : > { %v2754_v36 = vpop.eup %1831 }
 0x3ba   : > { %v1064_v11 = vmul.f32 1.442695, %v954_v55  ;;  %v1066_v63 = vmul.f32 1.442695, %v955_v32  ;;  %v1166_v62 = vadd.f32 %v2754_v36, %v2750_v57 }
 0x3bc   : > { %1833 = vpow2.f32 %v1064_v11 }
 0x3bd   : > { %1835 = vpow2.f32 %v1066_v63  ;;  %1194 = vadd.xlane.f32.xlu2 %v1193_v61 }
 0x3be   : > { %1837 = vrcp.f32 %v2685_v1  ;;  %1167 = vadd.xlane.f32.xlu1 %v1166_v62 }
 0x3bf   : > { %v1123_v22 = vpop.xlane.xlu2 %1122 }
 0x3c0   : > { %1839 = vrcp.f32 %v1123_v22  ;;  %v1144_v61 = vpop.xlane.xlu0 %1143 }
 0x3c1   : > { %1841 = vrcp.f32 %v2693_v33 }
 0x3c2   : > { %v2765_v16 = vpop.eup %1833 }
 0x3c3   : > { %v2767_v44 = vpop.eup %1835 }
 0x3c4   : > { %v1838_v30 = vpop.eup %1837  ;;  %v1169_v18 = vadd.f32 %v2767_v44, %v2765_v16 }
 0x3c5   : > { %v2773_v55 = vmul.f32 %v1838_v30, %v2490_v3  ;;  %v2779_v32 = vmul.f32 %v1838_v30, %v2492_v5 }
 0x3c6   : > { %v1840_v6 = vpop.eup %1839  ;;  %1170 = vadd.xlane.f32.xlu1 %v1169_v18 }
 0x3c7   : > { %v1129_v48 = vpop.xlane.xlu2 %1128  ;;  %v2776_v1 = vmul.f32 %v1840_v6, %v2604_v49  ;;  %v2782_v11 = vmul.f32 %v1840_v6, %v2606_v24  ;;  %v1842_v62 = vpop.eup %1841 }
 0x3c8   : > { %1843 = vrcp.f32 %v1129_v48  ;;  %v2791_v49 = vmul.f32 %v1842_v62, %v2506_v38  ;;  %v2797_v24 = vmul.f32 %v1842_v62, %v2510_v10  ;;  %v402_v38 = vld [vmem:[%s3029_s7 + $0x10] sm:$0xff]  ;;  %v2809_v48 = vpop.xlane.xlu0 %1191 }
 0x3c9   : > { %1845 = vrcp.f32 %v1183_v9 }
 0x3ce   : > { %v1844_v3 = vpop.eup %1843 }
 0x3cf   : > { %v2788_v22 = vpop.xlane.xlu2 %1134  ;;  %v2794_v5 = vmul.f32 %v1844_v3, %v2620_v7  ;;  %v2800_v30 = vmul.f32 %v1844_v3, %v2622_v31  ;;  %v1846_v10 = vpop.eup %1845  ;;  %v403_v31 = vld [vmem:[%s3029_s7 + $0x18] sm:$0xff]  ;;  %v3136_v3 = vld [vmem:[#allocation17_spill] sm:$0xff] }
 0x3d0   : > { %v2817_v6 = vmul.f32 %v1846_v10, %v2574_v20  ;;  %v2826_v45 = vmul.f32 %v1846_v10, %v2578_v27 }
 0x3d5   : > { %416 = vperm.xlu2 %1711, %v402_v38  }
 0x3d7   : > { %v1180_v7 = vpop.xlane.xlu2 %1179 }
 0x3d8   : > { %1847 = vrcp.f32 %v1180_v7 }
 0x3d9   : > { %1849 = vrcp.f32 %v1186_v28 }
 0x3db   : > { %v412_v62 = vpop.permute.xlu0 %411 }
 0x3dc   : > { %v452_v40 = vadd.f32 %v3136_v3, %v412_v62  ;;  %v471_v33 = vadd.f32 %v3137_v59, %v412_v62  ;;  %v3139_v62 = vld [vmem:[#allocation33_spill] sm:$0xff] }
 0x3de   : > { %v1848_v63 = vpop.eup %1847  ;;  %v488_v18 = vpack.c.bf16 %v471_v33, %v452_v40  ;;  %v3138_v33 = vld [vmem:[#allocation32_spill] sm:$0xff] }
 0x3df   : > { %421 = vperm.xlu1 %1712, %v403_v31   ;;  %v1141_v9 = vpop.xlane.xlu2 %1140  ;;  %v2820_v38 = vmul.f32 %v1848_v63, %v2646_v15  ;;  %v2823_v7 = vmul.f32 %v1848_v63, %v2648_v21  ;;  %v944_v15 = vsub.f32 %v3138_v33, %v2651_v56  ;;  %v945_v21 = vsub.f32 %v3139_v62, %v2651_v56  ;;  %v1850_v63 = vpop.eup %1849 }
 0x3e0   : > { %492 = vst [vmem:[#allocation3 + $0x8] sm:$0xff] %v488_v18  ;;  %v2837_v3 = vmul.f32 %v1850_v63, %v2590_v17  ;;  %v2843_v28 = vmul.f32 %v1850_v63, %v2594_v43  ;;  %v947_v43 = vsub.f32 %v2440_v58, %v2714_v8 }
 0x3e1   : > { %v1044_v27 = vmul.f32 1.442695, %v944_v15  ;;  %v1046_v10 = vmul.f32 1.442695, %v945_v21 }
 0x3e7   : > { %v1189_v40 = vpop.xlane.xlu2 %1188 }
 0x3e8   : > { %1851 = vrcp.f32 %v1189_v40 }
 0x3e9   : > { %1853 = vrcp.f32 %v1144_v61 }
 0x3ee   : > { %v1852_v31 = vpop.eup %1851 }
 0x3ef   : > { %v1147_v18 = vpop.xlane.xlu2 %1146  ;;  %v2840_v20 = vmul.f32 %v1852_v31, %v2669_v39  ;;  %v2846_v40 = vmul.f32 %v1852_v31, %v2671_v52  ;;  %v1854_v17 = vpop.eup %1853  ;;  %v946_v39 = vsub.f32 %v2436_v35, %v2714_v8  ;;  %v3141_v35 = vld [vmem:[#allocation13_spill] sm:$0xff] }
 0x3f0   : > { %1855 = vrcp.f32 %v1147_v18  ;;  %v1256_v52 = vmul.f32 %v1854_v17, %v2608_v50  ;;  %v1257_v15 = vmul.f32 %v1854_v17, %v2612_v54  ;;  %v1050_v50 = vmul.f32 1.442695, %v947_v43 }
 0x3f1   : > { %v1324_v56 = vpack.c.bf16 %v2840_v20, %v2837_v3  ;;  %1857 = vpow2.f32 %v1044_v27  ;;  %v1048_v58 = vmul.f32 1.442695, %v946_v39  ;;  %v3166_v20 = vld [vmem:[#allocation47_spill] sm:$0xff] }
 0x3f2   : > { %1859 = vpow2.f32 %v1046_v10 }
 0x3f3   : > { %1861 = vrcp.f32 %v1141_v9  ;;  %v3140_v9 = vld [vmem:[#allocation15_spill] sm:$0xff] }
 0x3f4   : > { %1863 = vrcp.f32 %v2726_v29 }
 0x3f5   : > { %1865 = vrcp.f32 %v2716_v46 }
 0x3f6   : > { %v1856_v33 = vpop.eup %1855  ;;  %1867 = vrcp.f32 %v2788_v22 }
 0x3f7   : > { %v1258_v62 = vmul.f32 %v1856_v33, %v2675_v4  ;;  %v1259_v21 = vmul.f32 %v1856_v33, %v2677_v13  ;;  %v407_v63 = vpop.permute.xlu2 %406  ;;  %v2861_v31 = vpop.eup %1857  ;;  %1869 = vpow2.f32 %v1048_v58 }
 0x3f8   : > { %v450_v27 = vadd.f32 %v3140_v9, %v407_v63  ;;  %v469_v10 = vadd.f32 %v3141_v35, %v407_v63  ;;  %v2865_v18 = vpop.eup %1859  ;;  %1871 = vpow2.f32 %v1050_v50  ;;  %v1102_v63 = vpop.xlane.xlu1 %1101  ;;  %v3142_v9 = vpack.c.bf16 %v2794_v5, %v2791_v49 }
 0x3f9   : > { %v1310_v8 = vpack.c.bf16 %v1258_v62, %v1256_v52  ;;  %v1311_v29 = vpack.c.bf16 %v1259_v21, %v1257_v15  ;;  %v1862_v59 = vpop.eup %1861  ;;  %v1154_v4 = vadd.f32 %v2865_v18, %v2861_v31  ;;  %v3147_v49 = vpack.c.bf16 %v2742_v14, %v2739_v0 }
 0x3fa   : > { %v487_v61 = vpack.c.bf16 %v469_v10, %v450_v27  ;;  %v1864_v54 = vpop.eup %1863  ;;  %v1254_v13 = vmul.f32 %v1862_v59, %v2656_v51  ;;  %v1255_v17 = vmul.f32 %v1862_v59, %v2658_v53  ;;  %v3146_v27 = vld [vmem:[#allocation21_spill] sm:$0xff]  ;;  %v3148_v5 = vpack.c.bf16 %v2748_v37, %v2745_v60  ;;  %v3151_v10 = vld [vmem:[#allocation42_spill] sm:$0xff] }
 0x3fb   : > { %1348 = vmatpush.bf16.xpose.msrb.mxu2 %v1310_v8  ;;  %1367 = vmatpush.bf16.xpose.msra.mxu3 %v1311_v29  ;;  %v1252_v39 = vmul.f32 %v1864_v54, %v2558_v25  ;;  %v1253_v46 = vmul.f32 %v1864_v54, %v2560_v26  ;;  %v1866_v33 = vpop.eup %1865  ;;  %v3153_v8 = vld [vmem:[#allocation38_spill] sm:$0xff]  ;;  %v3154_v37 = vld [vmem:[#allocation45_spill] sm:$0xff] }
 0x3fc   : > { %491 = vst [vmem:[#allocation3] sm:$0xff] %v487_v61  ;;  %v1868_v15 = vpop.eup %1867  ;;  %v1248_v25 = vmul.f32 %v1866_v33, %v2534_v2  ;;  %v1249_v26 = vmul.f32 %v1866_v33, %v2536_v19  ;;  %v3144_v2 = vpack.c.bf16 %v2776_v1, %v2773_v55  ;;  %v3145_v19 = vpack.c.bf16 %v2782_v11, %v2779_v32  ;;  %v3150_v55 = vld [vmem:[#allocation41_spill] sm:$0xff]  ;;  %v3157_v33 = vld [vmem:[#allocation40_spill] sm:$0xff] }
 0x3fd   : > { %v1308_v43 = vpack.c.bf16 %v1254_v13, %v1252_v39  ;;  %v1309_v52 = vpack.c.bf16 %v1255_v17, %v1253_v46  ;;  %v2875_v22 = vpop.eup %1869  ;;  %v1250_v51 = vmul.f32 %v1868_v15, %v2636_v34  ;;  %v1251_v53 = vmul.f32 %v1868_v15, %v2638_v23  ;;  %v3152_v11 = vld [vmem:[#allocation37_spill] sm:$0xff]  ;;  %v3155_v13 = vld [vmem:[#allocation46_spill] sm:$0xff]  ;;  %v3156_v39 = vld [vmem:[#allocation39_spill] sm:$0xff] }
 0x3fe   : > { %1155 = vadd.xlane.f32.xlu2 %v1154_v4  ;;  %v2877_v61 = vpop.eup %1871  ;;  %v3143_v34 = vpack.c.bf16 %v2800_v30, %v2797_v24  ;;  %v3149_v30 = vld [vmem:[#allocation27_spill] sm:$0xff] }
 0x3ff   : > { %v1157_v59 = vadd.f32 %v2877_v61, %v2875_v22  ;;  %v1306_v62 = vpack.c.bf16 %v1250_v51, %v1248_v25  ;;  %v1307_v21 = vpack.c.bf16 %v1251_v53, %v1249_v26 }
 0x400   : > { %v1111_v23 = vpop.xlane.xlu1 %1110 }
 0x401   : > { %1873 = vrcp.f32 %v1111_v23  ;;  %v1616_v23 = vld [vmem:[#allocation3 + $0x8] sm:$0xf0] }
 0x402   : > { %1875 = vrcp.f32 %v3146_v27 }
 0x403   : > { %1349 = vmatpush.bf16.xpose.msrb.mxu2 %v1308_v43  ;;  %1368 = vmatpush.bf16.xpose.msra.mxu3 %v1309_v52  ;;  %1877 = vrcp.f32 %v3149_v30  ;;  %v1614_v25 = vld [vmem:[#allocation3] sm:$0xf]  ;;  %v1636_v26 = vld [vmem:[#allocation3 + $0x4] sm:$0xf]  ;;  %v3161_v30 = vld [vmem:[#allocation16_spill] sm:$0xff] }
 0x404   : > { %1879 = vrcp.f32 %v1102_v63 }
 0x405   : > { %1881 = vrcp.f32 %v2809_v48  ;;  %v1637_v48 = vld [vmem:[#allocation3 + $0x4] sm:$0xf0] }
 0x407   : > { %v1874_v35 = vpop.eup %1873 }
 0x408   : > { %v1876_v24 = vpop.eup %1875  ;;  %v1234_v1 = vmul.f32 %v1874_v35, %v3150_v55  ;;  %v1235_v32 = vmul.f32 %v1874_v35, %v3151_v10  ;;  %v1177_v60 = vpop.xlane.xlu1 %1176  ;;  %v2918_v35 = vor.u32 %v1637_v48, %v1614_v25 }
 0x409   : > { %1158 = vadd.xlane.f32.xlu1 %v1157_v59  ;;  %v1232_v58 = vmul.f32 %v1876_v24, %v3152_v11  ;;  %v1233_v29 = vmul.f32 %v1876_v24, %v3153_v8  ;;  %v1878_v0 = vpop.eup %1877  ;;  %v3163_v11 = vld [vmem:[#allocation24_spill] sm:$0xff] }
 0x40a   : > { %v1880_v14 = vpop.eup %1879  ;;  %v1230_v4 = vmul.f32 %v1878_v0, %v3154_v37  ;;  %v1231_v17 = vmul.f32 %v1878_v0, %v3155_v13 }
 0x40b   : > { %1350 = vmatpush.bf16.xpose.msrb.mxu2 %v1306_v62  ;;  %1369 = vmatpush.bf16.xpose.msra.mxu3 %v1307_v21  ;;  %v1298_v50 = vpack.c.bf16 %v1234_v1, %v1232_v58  ;;  %v1299_v54 = vpack.c.bf16 %v1235_v32, %v1233_v29  ;;  %v1228_v46 = vmul.f32 %v1880_v14, %v3156_v39  ;;  %v1882_v53 = vpop.eup %1881  ;;  %v3158_v21 = vld [vmem:[#allocation49_spill] sm:$0xff] }
 0x40c   : > { %v1229_v43 = vmul.f32 %v1880_v14, %v3157_v33  ;;  %v1288_v63 = vmul.f32 %v1882_v53, %v3158_v21  ;;  %v3164_v29 = vpack.c.bf16 %v2817_v6, %v2820_v38  ;;  %v3169_v14 = vld [vmem:[#allocation44_spill] sm:$0xff]  ;;  %v3171_v6 = vld [vmem:[#allocation18_spill] sm:$0xff] }
 0x40d   : > { %v1296_v15 = vpack.c.bf16 %v1230_v4, %v1228_v46  ;;  %v3170_v4 = vld [vmem:[#allocation20_spill] sm:$0xff] }
 0x40e   : > { %v1297_v51 = vpack.c.bf16 %v1231_v17, %v1229_v43 }
 0x413   : > { %1351 = vmatpush.bf16.xpose.msrb.mxu2 %v3142_v9  ;;  %1370 = vmatpush.bf16.xpose.msra.mxu3 %v3143_v34  ;;  %v3159_v9 = vld [vmem:[#allocation50_spill] sm:$0xff] }
 0x414   : > { %v1289_v34 = vmul.f32 %v1882_v53, %v3159_v9 }
 0x41b   : > { %1352 = vmatpush.bf16.xpose.msrb.mxu2 %v3144_v2  ;;  %1371 = vmatpush.bf16.xpose.msra.mxu3 %v3145_v19 }
 0x423   : > { %1353 = vmatpush.bf16.xpose.msrb.mxu2 %v3147_v49  ;;  %1372 = vmatpush.bf16.xpose.msra.mxu3 %v3148_v5  ;;  %v2920_v49 = vor.u32 %v1636_v26, %v1616_v23  ;;  %v3160_v5 = vld [vmem:[#allocation19_spill] sm:$0xff]  ;;  %v3173_v23 = vld [vmem:[#allocation22_spill] sm:$0xff] }
 0x429   : > { %v1165_v59 = vpop.xlane.xlu1 %1164 }
 0x42b   : > { %1354 = vmatpush.bf16.xpose.msrb.mxu2 %v1298_v50  ;;  %1373 = vmatpush.bf16.xpose.msra.mxu3 %v1299_v54  ;;  %v3165_v50 = vpack.c.bf16 %v2826_v45, %v2823_v7  ;;  %v1162_v7 = vpop.xlane.xlu0 %1161 }
 0x430   : > { %v1195_v52 = vpop.xlane.xlu2 %1194 }
 0x431   : > { %1883 = vrcp.f32 %v1195_v52 }
 0x432   : > { %1885 = vrcp.f32 %v1177_v60 }
 0x433   : > { %1355 = vmatpush.bf16.xpose.msrb.mxu2 %v1296_v15  ;;  %1374 = vmatpush.bf16.xpose.msra.mxu3 %v1297_v51  ;;  %1887 = vrcp.f32 %v3163_v11 }
 0x437   : > { %v1884_v62 = vpop.eup %1883 }
 0x438   : > { %v1290_v2 = vmul.f32 %v1884_v62, %v2734_v47  ;;  %v1291_v19 = vmul.f32 %v1884_v62, %v2736_v12  ;;  %v417_v27 = vpop.permute.xlu2 %416  ;;  %v1168_v47 = vpop.xlane.xlu1 %1167  ;;  %v3162_v12 = vpack.c.bf16 %v2846_v40, %v2843_v28  ;;  %v3168_v40 = vld [vmem:[#allocation43_spill] sm:$0xff] }
 0x439   : > { %v455_v24 = vadd.f32 %v3160_v5, %v417_v27  ;;  %v474_v55 = vadd.f32 %v3161_v30, %v417_v27  ;;  %v1886_v8 = vpop.eup %1885  ;;  %v1150_v5 = vpop.xlane.xlu0 %1149 }
 0x43a   : > { %1356 = vmatmul.bf16.vlgmr.msrb.gmra.mxu2 %v2918_v35  ;;  %1375 = vmatmul.bf16.vlgmr.msra.gmra.mxu3 %v2920_v49  ;;  %v1326_v1 = vpack.c.bf16 %v1290_v2, %v1288_v63  ;;  %v1327_v10 = vpack.c.bf16 %v1291_v19, %v1289_v34  ;;  %v1888_v54 = vpop.eup %1887  ;;  %v1278_v3 = vmul.f32 %v1886_v8, %v3166_v20 }
 0x43b   : > { %v489_v32 = vpack.c.bf16 %v474_v55, %v455_v24  ;;  %v1276_v0 = vmul.f32 %v1888_v54, %v3168_v40  ;;  %v1277_v60 = vmul.f32 %v1888_v54, %v3169_v14  ;;  %v3175_v54 = vld [vmem:[#allocation28_spill] sm:$0xff] }
 0x43c   : > { %1386 = vmatpush.bf16.xpose.msra.mxu2 %v1326_v1  ;;  %1405 = vmatpush.bf16.xpose.msrb.mxu3 %v1327_v10 }
 0x43d   : > { %493 = vst [vmem:[#allocation3 + $0x10] sm:$0xff] %v489_v32  ;;  %v1320_v17 = vpack.c.bf16 %v1278_v3, %v1276_v0  ;;  %v3176_v3 = vld [vmem:[#allocation23_spill] sm:$0xff]  ;;  %v1425_v0 = vstv %s1424_s17 }
 0x440   : > { %v1171_v58 = vpop.xlane.xlu1 %1170 }
 0x441   : > { %1889 = vrcp.f32 %v1171_v58  ;;  %v1153_v55 = vpop.xlane.xlu0 %1152 }
 0x442   : > { %1891 = vrcp.f32 %v1168_v47 }
 0x443   : > { %1893 = vrcp.f32 %v1165_v59 }
 0x444   : > { %1387 = vmatpush.bf16.xpose.msra.mxu2 %v1324_v56  ;;  %1406 = vmatpush.bf16.xpose.msrb.mxu3 %v3162_v12  ;;  %v3167_v56 = vld [vmem:[#allocation48_spill] sm:$0xff]  ;;  %1895 = vrcp.f32 %v1162_v7  ;;  %v1622_v62 = vld [vmem:[#allocation3 + $0x10] sm:$0xf]  ;;  %v1638_v9 = vld [vmem:[#allocation3 + $0x14] sm:$0xf] }
 0x445   : > { %v1279_v28 = vmul.f32 %v1886_v8, %v3167_v56 }
 0x447   : > { %v1321_v39 = vpack.c.bf16 %v1279_v28, %v1277_v60  ;;  %v1890_v45 = vpop.eup %1889  ;;  %v3177_v28 = vld [vmem:[#allocation26_spill] sm:$0xff] }
 0x448   : > { %v1892_v33 = vpop.eup %1891  ;;  %v1274_v43 = vmul.f32 %v1890_v45, %v2765_v16  ;;  %v1275_v52 = vmul.f32 %v1890_v45, %v2767_v44 }
 0x449   : > { %v1272_v15 = vmul.f32 %v1892_v33, %v2750_v57  ;;  %v1273_v51 = vmul.f32 %v1892_v33, %v2754_v36  ;;  %v1894_v26 = vpop.eup %1893  ;;  %v3172_v57 = vld [vmem:[#allocation36_spill] sm:$0xff]  ;;  %v1907_v33 = vld [vmem:[%s2160_s16 + $0x20] sm:$0xff] }
 0x44a   : > { %v1896_v21 = vpop.eup %1895  ;;  %v1270_v16 = vmul.f32 %v1894_v26, %v2728_v42  ;;  %v1271_v44 = vmul.f32 %v1894_v26, %v2730_v41 }
 0x44b   : > { %v1318_v53 = vpack.c.bf16 %v1274_v43, %v1272_v15  ;;  %v1319_v25 = vpack.c.bf16 %v1275_v52, %v1273_v51  ;;  %v1268_v36 = vmul.f32 %v1896_v21, %v3172_v57  ;;  %v1269_v2 = vmul.f32 %v1896_v21, %v3173_v23 }
 0x44c   : > { %1388 = vmatpush.bf16.xpose.msra.mxu2 %v3164_v29  ;;  %1407 = vmatpush.bf16.xpose.msrb.mxu3 %v3165_v50  ;;  %v3174_v29 = vld [vmem:[#allocation25_spill] sm:$0xff] }
 0x44d   : > { %v1316_v19 = vpack.c.bf16 %v1270_v16, %v1268_v36  ;;  %v1317_v27 = vpack.c.bf16 %v1271_v44, %v1269_v2  ;;  %v1910_v36 = vld [vmem:[%s2160_s16 + $0x18] sm:$0xff] }
 0x451   : > { %v422_v37 = vpop.permute.xlu1 %421 }
 0x452   : > { %v457_v13 = vadd.f32 %v3170_v4, %v422_v37  ;;  %v476_v38 = vadd.f32 %v3171_v6, %v422_v37  ;;  %v1905_v37 = vld [vmem:[%s2160_s16] sm:$0xff] }
 0x454   : > { %v490_v46 = vpack.c.bf16 %v476_v38, %v457_v13  ;;  %1389 = vmatpush.bf16.xpose.msra.mxu2 %v1320_v17  ;;  %1408 = vmatpush.bf16.xpose.msrb.mxu3 %v1321_v39  ;;  %v1906_v38 = vld [vmem:[%s2160_s16 + $0x10] sm:$0xff] }
 0x456   : > { %494 = vst [vmem:[#allocation3 + $0x18] sm:$0xff] %v490_v46 }
 0x45c   : > { %1390 = vmatpush.bf16.xpose.msra.mxu2 %v1318_v53  ;;  %1409 = vmatpush.bf16.xpose.msrb.mxu3 %v1319_v25  ;;  %v1908_v25 = vld [vmem:[%s2160_s16 + $0x30] sm:$0xff] }
 0x45d   : > { %v1639_v63 = vld [vmem:[#allocation3 + $0x14] sm:$0xf0]  ;;  %v1624_v59 = vld [vmem:[#allocation3 + $0x18] sm:$0xf0] }
 0x45e   : > { %v1623_v34 = vor.u32 %v1639_v63, %v1622_v62  ;;  %v1627_v48 = vor.u32 %v1638_v9, %v1624_v59  ;;  %v1909_v59 = vld [vmem:[%s2160_s16 + $0x8] sm:$0xff] }
 0x460   : > { %1361 = vmatmul.bf16.gmra.mxu2 %v1623_v34  ;;  %1380 = vmatmul.bf16.gmra.mxu3 %v1627_v48 }
 0x464   : > { %1391 = vmatpush.bf16.xpose.msra.mxu2 %v1316_v19  ;;  %1410 = vmatpush.bf16.xpose.msrb.mxu3 %v1317_v27 }
 0x471   : > { %v1156_v24 = vpop.xlane.xlu2 %1155 }
 0x472   : > { %1897 = vrcp.f32 %v1156_v24  ;;  %v1911_v24 = vld [vmem:[%s2160_s16 + $0x28] sm:$0xff] }
 0x478   : > { %v1898_v1 = vpop.eup %1897 }
 0x479   : > { %v1264_v41 = vmul.f32 %v1898_v1, %v2861_v31  ;;  %v1265_v32 = vmul.f32 %v1898_v1, %v2865_v18 }
 0x47c   : > { %v1159_v30 = vpop.xlane.xlu1 %1158 }
 0x47d   : > { %1899 = vrcp.f32 %v1159_v30 }
 0x47e   : > { %1901 = vrcp.f32 %v1153_v55 }
 0x47f   : > { %1903 = vrcp.f32 %v1150_v5 }
 0x483   : > { %v1900_v42 = vpop.eup %1899 }
 0x484   : > { %v1266_v10 = vmul.f32 %v1900_v42, %v2875_v22  ;;  %v1267_v47 = vmul.f32 %v1900_v42, %v2877_v61  ;;  %v1902_v58 = vpop.eup %1901 }
 0x485   : > { %v1904_v8 = vpop.eup %1903  ;;  %v1262_v50 = vmul.f32 %v1902_v58, %v3174_v29  ;;  %v1263_v20 = vmul.f32 %v1902_v58, %v3175_v54 }
 0x486   : > { %v1314_v12 = vpack.c.bf16 %v1266_v10, %v1264_v41  ;;  %v1315_v11 = vpack.c.bf16 %v1267_v47, %v1265_v32  ;;  %v1260_v56 = vmul.f32 %v1904_v8, %v3176_v3  ;;  %v1261_v31 = vmul.f32 %v1904_v8, %v3177_v28  ;;  %v1912_v10 = vld [vmem:[%s2160_s16 + $0x38] sm:$0xff] }
 0x488   : > { %1392 = vmatpush.bf16.xpose.msra.mxu2 %v1314_v12  ;;  %1411 = vmatpush.bf16.xpose.msrb.mxu3 %v1315_v11  ;;  %v1312_v22 = vpack.c.bf16 %v1262_v50, %v1260_v56  ;;  %v1313_v18 = vpack.c.bf16 %v1263_v20, %v1261_v31 }
 0x490   : > { %1393 = vmatpush.bf16.xpose.msra.mxu2 %v1312_v22  ;;  %1412 = vmatpush.bf16.xpose.msrb.mxu3 %v1313_v18 }
 0x497   : > { %1394 = vmatmul.bf16.vlgmr.msra.gmra.mxu2 %v2918_v35  ;;  %1413 = vmatmul.bf16.vlgmr.msrb.gmra.mxu3 %v2920_v49 }
 0x4a7   : > { %1399 = vmatmul.bf16.gmra.mxu2 %v1623_v34  ;;  %1418 = vmatmul.bf16.gmra.mxu3 %v1627_v48 }
 0x4bd   : > { %v1357_v61 = vpop.f32.mrf.mxu2  ;;  %v1376_v40 = vpop.f32.mrf.mxu3 }
 0x4be   : > { %v1377_v14 = vadd.f32 %v1376_v40, %v1357_v61 }
 0x4c0   : > { %v1426_v60 = vmul.f32 %v1425_v0, %v1377_v14 }
 0x4c2   : > { %v1434_v4 = vadd.f32 %v1905_v37, %v1426_v60 }
 0x4c4   : > { %1442 = vst [vmem:[%s2966_s13] sm:$0xff] %v1434_v4 }
 0x4c5   : > { %v1359_v35 = vpop.f32.mrf.mxu2  ;;  %v1378_v49 = vpop.f32.mrf.mxu3 }
 0x4c6   : > { %v1379_v13 = vadd.f32 %v1378_v49, %v1359_v35 }
 0x4c8   : > { %v1428_v6 = vmul.f32 %v1425_v0, %v1379_v13 }
 0x4ca   : > { %v1436_v17 = vadd.f32 %v1906_v38, %v1428_v6 }
 0x4cc   : > { %1444 = vst [vmem:[%s2966_s13 + $0x10] sm:$0xff] %v1436_v17 }
 0x4e3   : > { %v1362_v39 = vpop.f32.mrf.mxu2  ;;  %v1381_v45 = vpop.f32.mrf.mxu3 }
 0x4e4   : > { %v1382_v7 = vadd.f32 %v1381_v45, %v1362_v39 }
 0x4e6   : > { %v1430_v46 = vmul.f32 %v1425_v0, %v1382_v7 }
 0x4e8   : > { %v1438_v43 = vadd.f32 %v1907_v33, %v1430_v46 }
 0x4ea   : > { %1446 = vst [vmem:[%s2966_s13 + $0x20] sm:$0xff] %v1438_v43 }
 0x4eb   : > { %v1364_v52 = vpop.f32.mrf.mxu2  ;;  %v1383_v15 = vpop.f32.mrf.mxu3 }
 0x4ec   : > { %v1384_v51 = vadd.f32 %v1383_v15, %v1364_v52 }
 0x4ee   : > { %v1432_v53 = vmul.f32 %v1425_v0, %v1384_v51 }
 0x4f0   : > { %v1440_v26 = vadd.f32 %v1908_v25, %v1432_v53 }
 0x4f2   : > { %1448 = vst [vmem:[%s2966_s13 + $0x30] sm:$0xff] %v1440_v26 }
 0x51a   : > { %v1395_v62 = vpop.f32.mrf.mxu2  ;;  %v1414_v21 = vpop.f32.mrf.mxu3 }
 0x51b   : > { %v1415_v63 = vadd.f32 %v1414_v21, %v1395_v62 }
 0x51d   : > { %v1427_v9 = vmul.f32 %v1425_v0, %v1415_v63 }
 0x51f   : > { %v1435_v34 = vadd.f32 %v1909_v59, %v1427_v9 }
 0x521   : > { %1443 = vst [vmem:[%s2966_s13 + $0x8] sm:$0xff] %v1435_v34 }
 0x522   : > { %v1397_v48 = vpop.f32.mrf.mxu2  ;;  %v1416_v16 = vpop.f32.mrf.mxu3 }
 0x523   : > { %v1417_v44 = vadd.f32 %v1416_v16, %v1397_v48 }
 0x525   : > { %v1429_v57 = vmul.f32 %v1425_v0, %v1417_v44 }
 0x527   : > { %v1437_v23 = vadd.f32 %v1910_v36, %v1429_v57 }
 0x529   : > { %1445 = vst [vmem:[%s2966_s13 + $0x18] sm:$0xff] %v1437_v23 }
 0x52a   : > { %v1400_v2 = vpop.f32.mrf.mxu2  ;;  %v1419_v19 = vpop.f32.mrf.mxu3 }
 0x52b   : > { %v1420_v27 = vadd.f32 %v1419_v19, %v1400_v2 }
 0x52d   : > { %v1431_v5 = vmul.f32 %v1425_v0, %v1420_v27 }
 0x52f   : > { %v1439_v30 = vadd.f32 %v1911_v24, %v1431_v5 }
 0x531   : > { %1447 = vst [vmem:[%s2966_s13 + $0x28] sm:$0xff] %v1439_v30 }
 0x532   : > { %v1402_v55 = vpop.f32.mrf.mxu2  ;;  %v1421_v1 = vpop.f32.mrf.mxu3 }
 0x533   : > { %v1422_v42 = vadd.f32 %v1421_v1, %v1402_v55 }
 0x535   : > { %v1433_v41 = vmul.f32 %v1425_v0, %v1422_v42 }
 0x537   : > { %v1441_v32 = vadd.f32 %v1912_v10, %v1433_v41 }
 0x539   : > { %1449 = vst [vmem:[%s2966_s13 + $0x38] sm:$0xff] %v1441_v32 }
 0x53a   : > { %1970 = shalt.err (!%p1967_p13)
}
 0x53b   : > { %s2030_s11 = smov 256   ;;  %s2031_s16 = smov 16  }
 0x53c   : > { %1645 = dma.vmem_to_hbm [thread:$0]  (%p2131_p9), %s1466_s18, 1024, %s1468_s22, %s1451_s10, %s2030_s11, %s2030_s11, %s2031_s16  }
 0x53d PF: > { %s1482_s13 = sand.u32 1, %s2005_s29   ;;  %p1652_p0 = pnand %p1557_p12, %p2138_p11 }
 0x53e   : > { %s1483_s15 = scalar_lea.sflag [#allocation7], %s1482_s13 }
 0x53f   : > { %p1653_p1 = pneg %p1652_p0 }
 0x541   : > { %2000 = dma.done.wait (%p1653_p1), %s1483_s15, 1024  }
 0x542   : > { %2002 = vsyncadd (%p1653_p1), %s1483_s15, 4294966272  ;;  %s25_s12 = sadd.s32 1, %s2025_s12   ;;  %s3178_s10 = sld [smem:[#allocation11_spill]] }
 0x543   : > { %p22_p2 = scmp.ge.s32.totalorder %s25_s12, 4   ;;  %s3179_s11 = sld [smem:[#allocation12_spill]] }
 0x544   : > { %s3180_s29 = smov %s2009_s30  ;;  %s3181_s30 = smov %s2013_s9 }
 0x545   : > { %s3182_s9 = smov %s2136_s20  ;;  %24 = sbr.rel (!%p22_p2) target bundleno = 8 (0x8), region = 102 }
 0x54a   :  { %1489 = vsyncpa [#allocation6], 1 }
 0x54b   :  { %1491 = vsyncpa [#allocation6 + $0x1], 1 }
 0x54c   :  { %1492 = vsyncpa [#allocation7], 1 }
 0x54d   :  { %1494 = vsyncpa [#allocation7 + $0x1], 1 }

</bundles_post_ra>
